<compile_context>
chip_gen: v6e
topology: v6e:2x2x1
jax: 0.10.0
libtpu: 0.0.40
codegen_flags: <defaults>
</compile_context>

<pallas_src>
import functools

import jax
import jax.numpy as jnp
from jax import lax
from jax.experimental import pallas as pl
from jax.experimental.pallas import tpu as pltpu


def _l2normalize(x):
    # F.normalize(x, p=2, dim=1, eps=1e-12) == x / max(||x||_2, eps)
    # rsqrt lowers to the EUP slot instead of a VPU divide.
    sumsq = jnp.sum(x * x, axis=-1, keepdims=True)
    return x * lax.rsqrt(jnp.maximum(sumsq, 1e-24))


def _fused_forward_kernel(
    # SMEM int32 index arrays
    user_idx_ref, pos_idx_ref, neg_idx_ref, tag_idx_ref,
    # VMEM tensors (adjacency bf16, embeddings f32)
    user_adj_ref, item_adj_ref, tag_adj_u_ref, tag_adj_i_ref,
    user_emb_ref, item_emb_ref, tag_emb_ref,
    # SMEM scalar outputs
    total_ref, mf_ref, emb_ref,
    # VMEM scratch
    agg_u_sc, agg_i_sc, agg_t_sc,
    ue_sc, pos_sc, tag_sc, upre_sc, negmean_sc, neg_sc,
    *, n_hops, batch, n_negs, decay):
    f32 = jnp.float32
    bf16 = jnp.bfloat16

    # ---------------- GraphConv: n_hops, fully VMEM-resident, bf16 MXU --------
    t_cur = tag_emb_ref[...]            # f32 (n_tags, D)
    agg_u = user_emb_ref[...]           # layer-0 term, weight 1
    agg_i = item_emb_ref[...]
    agg_t = t_cur
    for l in range(n_hops):             # small static trip count -> unrolled
        t_b = t_cur.astype(bf16)
        u_new = jnp.dot(user_adj_ref[...], t_b, preferred_element_type=f32)
        i_new = jnp.dot(item_adj_ref[...], t_b, preferred_element_type=f32)
        # tag_adj @ concat([u_new, i_new]) == tag_adj_u @ u_new + tag_adj_i @ i_new
        # (computed from the UN-normalized u_new / i_new, matching the reference)
        t_new = (jnp.dot(tag_adj_u_ref[...], u_new.astype(bf16),
                         preferred_element_type=f32)
                 + jnp.dot(tag_adj_i_ref[...], i_new.astype(bf16),
                           preferred_element_type=f32))
        u_new = _l2normalize(u_new)
        i_new = _l2normalize(i_new)
        t_new = _l2normalize(t_new)
        scale = 1.0 / (l + 1)           # hop l weighted 1/(l+1), layer-0 weight 1
        agg_u = agg_u + u_new * scale
        agg_i = agg_i + i_new * scale
        agg_t = agg_t + t_new * scale
        t_cur = t_new

    # Stage the aggregated tables in VMEM scratch so batch rows can be gathered
    # with dynamic row slices (no one-hot matrices, no MXU gather matmuls).
    agg_u_sc[...] = agg_u
    agg_i_sc[...] = agg_i
    agg_t_sc[...] = agg_t

    # ---------------- batch gathers: direct VMEM row loads --------------------
    inv_negs = 1.0 / n_negs
    for b in range(batch):
        u_idx = user_idx_ref[b]
        ue_sc[pl.ds(b, 1), :] = agg_u_sc[pl.ds(u_idx, 1), :]
        pos_sc[pl.ds(b, 1), :] = agg_i_sc[pl.ds(pos_idx_ref[b], 1), :]
        tag_sc[pl.ds(b, 1), :] = agg_t_sc[pl.ds(tag_idx_ref[b], 1), :]
        # pre-GCN user row for the regularizer, straight from the input ref
        upre_sc[pl.ds(b, 1), :] = user_emb_ref[pl.ds(u_idx, 1), :]
        neg_sum = None
        for n in range(n_negs):
            row = agg_i_sc[pl.ds(neg_idx_ref[b * n_negs + n], 1), :]
            neg_sc[pl.ds(b * n_negs + n, 1), :] = row
            neg_sum = row if neg_sum is None else neg_sum + row
        negmean_sc[pl.ds(b, 1), :] = neg_sum * inv_negs

    u_e = ue_sc[...]            # (B, D)
    pos_e = pos_sc[...]
    tag_e = tag_sc[...]
    u_pre = upre_sc[...]
    neg_mean = negmean_sc[...]  # (B, D)
    neg_all = neg_sc[...]       # (B*n_negs, D)

    # ---------------- losses ----------------------------------------------------
    # BPR: reference computes logsigmoid(pos - mean_n(neg_score)); the mean over
    # negatives is inside the (linear) dot product, so the mean embedding is exact.
    pos_scores = jnp.sum(u_e * pos_e, axis=1, keepdims=True)        # (B,1)
    mean_neg_scores = jnp.sum(u_e * neg_mean, axis=1, keepdims=True)
    x = pos_scores - mean_neg_scores
    log_sig = jnp.minimum(x, 0.0) - jnp.log1p(jnp.exp(-jnp.abs(x)))  # stable logsigmoid
    mf_loss = -jnp.mean(log_sig)

    # regularizer = (||user_emb[user]||_F^2 + ||pos_e||_F^2 + ||neg_e||_F^2) / 2
    regularizer = 0.5 * (jnp.sum(u_pre * u_pre) + jnp.sum(pos_e * pos_e)
                         + jnp.sum(neg_all * neg_all))
    emb_loss = (decay / batch) * regularizer

    # transRT: mean_b ||u_e + pos_e - tag_e||_2
    d = u_e + pos_e - tag_e
    rt_loss = jnp.mean(jnp.sqrt(jnp.sum(d * d, axis=1, keepdims=True)))

    total = mf_loss + emb_loss + 1e-5 * rt_loss
    total_ref[0, 0] = total
    mf_ref[0, 0] = mf_loss
    emb_ref[0, 0] = emb_loss


def recommender_forward(all_embed, user_adj, item_adj, tag_adj_u, tag_adj_i,
                        user, pos_item, neg_item, tag,
                        n_users, n_items, n_tags, n_hops, decay):
    dim = all_embed.shape[1]
    batch, n_negs = neg_item.shape

    all_embed = all_embed.astype(jnp.float32)
    user_emb = all_embed[:n_users]
    item_emb = all_embed[n_users:n_users + n_items]
    tag_emb = all_embed[n_users + n_items:]

    smem = pl.BlockSpec(memory_space=pltpu.MemorySpace.SMEM)
    vmem = pl.BlockSpec(memory_space=pltpu.MemorySpace.VMEM)
    scalar_out = jax.ShapeDtypeStruct((1, 1), jnp.float32)

    scratch_shapes = [
        pltpu.VMEM((n_users, dim), jnp.float32),          # agg_u
        pltpu.VMEM((n_items, dim), jnp.float32),          # agg_i
        pltpu.VMEM((n_tags, dim), jnp.float32),           # agg_t
        pltpu.VMEM((batch, dim), jnp.float32),            # u_e
        pltpu.VMEM((batch, dim), jnp.float32),            # pos_e
        pltpu.VMEM((batch, dim), jnp.float32),            # tag_e
        pltpu.VMEM((batch, dim), jnp.float32),            # u_pre
        pltpu.VMEM((batch, dim), jnp.float32),            # mean negative emb
        pltpu.VMEM((batch * n_negs, dim), jnp.float32),   # all negative rows
    ]

    kernel = functools.partial(
        _fused_forward_kernel,
        n_hops=n_hops, batch=batch, n_negs=n_negs, decay=float(decay))

    total, mf, emb = pl.pallas_call(
        kernel,
        in_specs=[smem] * 4 + [vmem] * 7,
        out_specs=[smem] * 3,
        out_shape=[scalar_out] * 3,
        scratch_shapes=scratch_shapes,
        # Explicit scoped-VMEM limit: raises v5e's 16 MiB default, equals the
        # v6e/v7x default, and stays within v7x's 64 MiB physical VMEM.
        compiler_params=pltpu.CompilerParams(vmem_limit_bytes=32 * 1024 * 1024),
    )(user.astype(jnp.int32), pos_item.astype(jnp.int32),
      neg_item.reshape(-1).astype(jnp.int32), tag.astype(jnp.int32),
      user_adj, item_adj, tag_adj_u, tag_adj_i,
      user_emb, item_emb, tag_emb)

    return total[0, 0], mf[0, 0], emb[0, 0]


if __name__ == "__main__":
    n_users, n_items, n_tags = 24, 40, 16
    n_nodes = n_users + n_items + n_tags
    dim = 32
    n_hops = 2
    batch = 8
    n_negs = 4
    decay = 1e-4

    key = jax.random.PRNGKey(0)
    k1, k2, k3, k4, k5, k6, k7, k8 = jax.random.split(key, 8)

    # xavier_uniform_ on (n_nodes, dim): bound = sqrt(6 / (fan_in + fan_out))
    bound = (6.0 / (n_nodes + dim)) ** 0.5
    all_embed = jax.random.uniform(k1, (n_nodes, dim), jnp.float32, -bound, bound)

    def rand_adj(k, shape, density=0.25):
        ka, kb = jax.random.split(k)
        vals = jax.random.uniform(ka, shape, jnp.float32)
        mask = jax.random.bernoulli(kb, density, shape)
        return (vals * mask).astype(jnp.float32)

    # Done ONCE at init (perf review): bf16 adjacency (MXU-native, half the
    # VMEM/HBM bytes) and the tag_adj column split, so the per-step path
    # carries no extra HBM passes or casts.
    user_adj = rand_adj(k2, (n_users, n_tags)).astype(jnp.bfloat16)
    item_adj = rand_adj(k3, (n_items, n_tags)).astype(jnp.bfloat16)
    tag_adj = rand_adj(k4, (n_tags, n_users + n_items))
    tag_adj_u = tag_adj[:, :n_users].astype(jnp.bfloat16)
    tag_adj_i = tag_adj[:, n_users:].astype(jnp.bfloat16)

    user = jax.random.randint(k5, (batch,), 0, n_users)
    pos_item = jax.random.randint(k6, (batch,), 0, n_items)
    neg_item = jax.random.randint(k7, (batch, n_negs), 0, n_items)  # == stack(list).t()
    tag = jax.random.randint(k8, (batch,), 0, n_tags)

    total, mf_loss, emb_loss = recommender_forward(
        all_embed, user_adj, item_adj, tag_adj_u, tag_adj_i,
        user, pos_item, neg_item, tag,
        n_users, n_items, n_tags, n_hops, decay)

    jax.block_until_ready((total, mf_loss, emb_loss))
    print("KERNEL_OK")
</pallas_src>

<mosaic_0001>
module attributes {stable_mosaic.version = 11 : i64} {
  func.func @_fused_forward_kernel(%arg0: memref<8xi32, #tpu.memory_space<smem>>, %arg1: memref<8xi32, #tpu.memory_space<smem>>, %arg2: memref<32xi32, #tpu.memory_space<smem>>, %arg3: memref<8xi32, #tpu.memory_space<smem>>, %arg4: memref<24x16xbf16, #tpu.memory_space<vmem>>, %arg5: memref<40x16xbf16, #tpu.memory_space<vmem>>, %arg6: memref<16x24xbf16, #tpu.memory_space<vmem>>, %arg7: memref<16x40xbf16, #tpu.memory_space<vmem>>, %arg8: memref<24x32xf32, #tpu.memory_space<vmem>>, %arg9: memref<40x32xf32, #tpu.memory_space<vmem>>, %arg10: memref<16x32xf32, #tpu.memory_space<vmem>>, %arg11: memref<1x1xf32, #tpu.memory_space<smem>>, %arg12: memref<1x1xf32, #tpu.memory_space<smem>>, %arg13: memref<1x1xf32, #tpu.memory_space<smem>>, %arg14: memref<24x32xf32, #tpu.memory_space<vmem>>, %arg15: memref<40x32xf32, #tpu.memory_space<vmem>>, %arg16: memref<16x32xf32, #tpu.memory_space<vmem>>, %arg17: memref<8x32xf32, #tpu.memory_space<vmem>>, %arg18: memref<8x32xf32, #tpu.memory_space<vmem>>, %arg19: memref<8x32xf32, #tpu.memory_space<vmem>>, %arg20: memref<8x32xf32, #tpu.memory_space<vmem>>, %arg21: memref<8x32xf32, #tpu.memory_space<vmem>>, %arg22: memref<32x32xf32, #tpu.memory_space<vmem>>) attributes {dimension_semantics = [], scalar_prefetch = 0 : i64, scratch_operands = 9 : i64, tpu.core_type = #tpu.core_type<tc>} {
    %c0 = arith.constant 0 : index
    %c0_0 = arith.constant 0 : index
    %0 = vector.load %arg10[%c0, %c0_0] : memref<16x32xf32, #tpu.memory_space<vmem>>, vector<16x32xf32>
    %c0_1 = arith.constant 0 : index
    %c0_2 = arith.constant 0 : index
    %1 = vector.load %arg8[%c0_1, %c0_2] : memref<24x32xf32, #tpu.memory_space<vmem>>, vector<24x32xf32>
    %c0_3 = arith.constant 0 : index
    %c0_4 = arith.constant 0 : index
    %2 = vector.load %arg9[%c0_3, %c0_4] : memref<40x32xf32, #tpu.memory_space<vmem>>, vector<40x32xf32>
    %3 = arith.truncf %0 : vector<16x32xf32> to vector<16x32xbf16>
    %c0_5 = arith.constant 0 : index
    %c0_6 = arith.constant 0 : index
    %4 = vector.load %arg4[%c0_5, %c0_6] : memref<24x16xbf16, #tpu.memory_space<vmem>>, vector<24x16xbf16>
    %cst = arith.constant dense<0.000000e+00> : vector<24x32xf32>
    %5 = tpu.matmul %4, %3, %cst {dimension_numbers = #tpu.dot_dimension_numbers<[1], [0], [0], [1], [0, 0, 1, 1], [], []>} : vector<24x16xbf16>, vector<16x32xbf16>, vector<24x32xf32> -> vector<24x32xf32>
    %c0_7 = arith.constant 0 : index
    %c0_8 = arith.constant 0 : index
    %6 = vector.load %arg5[%c0_7, %c0_8] : memref<40x16xbf16, #tpu.memory_space<vmem>>, vector<40x16xbf16>
    %cst_9 = arith.constant dense<0.000000e+00> : vector<40x32xf32>
    %7 = tpu.matmul %6, %3, %cst_9 {dimension_numbers = #tpu.dot_dimension_numbers<[1], [0], [0], [1], [0, 0, 1, 1], [], []>} : vector<40x16xbf16>, vector<16x32xbf16>, vector<40x32xf32> -> vector<40x32xf32>
    %c0_10 = arith.constant 0 : index
    %c0_11 = arith.constant 0 : index
    %8 = vector.load %arg6[%c0_10, %c0_11] : memref<16x24xbf16, #tpu.memory_space<vmem>>, vector<16x24xbf16>
    %9 = arith.truncf %5 : vector<24x32xf32> to vector<24x32xbf16>
    %cst_12 = arith.constant dense<0.000000e+00> : vector<16x32xf32>
    %10 = tpu.matmul %8, %9, %cst_12 {dimension_numbers = #tpu.dot_dimension_numbers<[1], [0], [0], [1], [0, 0, 1, 1], [], []>} : vector<16x24xbf16>, vector<24x32xbf16>, vector<16x32xf32> -> vector<16x32xf32>
    %c0_13 = arith.constant 0 : index
    %c0_14 = arith.constant 0 : index
    %11 = vector.load %arg7[%c0_13, %c0_14] : memref<16x40xbf16, #tpu.memory_space<vmem>>, vector<16x40xbf16>
    %12 = arith.truncf %7 : vector<40x32xf32> to vector<40x32xbf16>
    %cst_15 = arith.constant dense<0.000000e+00> : vector<16x32xf32>
    %13 = tpu.matmul %11, %12, %cst_15 {dimension_numbers = #tpu.dot_dimension_numbers<[1], [0], [0], [1], [0, 0, 1, 1], [], []>} : vector<16x40xbf16>, vector<40x32xbf16>, vector<16x32xf32> -> vector<16x32xf32>
    %14 = arith.addf %10, %13 : vector<16x32xf32>
    %15 = arith.mulf %5, %5 : vector<24x32xf32>
    %cst_16 = arith.constant dense<0.000000e+00> : vector<24xf32>
    %16 = vector.multi_reduction <add>, %15, %cst_16 [1] : vector<24x32xf32> to vector<24xf32>
    %17 = vector.shape_cast %16 : vector<24xf32> to vector<24x1xf32>
    %cst_17 = arith.constant 1.000000e-24 : f32
    %18 = vector.broadcast %cst_17 : f32 to vector<24x1xf32>
    %19 = arith.maximumf %17, %18 : vector<24x1xf32>
    %20 = math.rsqrt %19 : vector<24x1xf32>
    %21 = vector.broadcast %20 : vector<24x1xf32> to vector<24x32xf32>
    %22 = arith.mulf %5, %21 : vector<24x32xf32>
    %23 = arith.mulf %7, %7 : vector<40x32xf32>
    %cst_18 = arith.constant dense<0.000000e+00> : vector<40xf32>
    %24 = vector.multi_reduction <add>, %23, %cst_18 [1] : vector<40x32xf32> to vector<40xf32>
    %25 = vector.shape_cast %24 : vector<40xf32> to vector<40x1xf32>
    %cst_19 = arith.constant 1.000000e-24 : f32
    %26 = vector.broadcast %cst_19 : f32 to vector<40x1xf32>
    %27 = arith.maximumf %25, %26 : vector<40x1xf32>
    %28 = math.rsqrt %27 : vector<40x1xf32>
    %29 = vector.broadcast %28 : vector<40x1xf32> to vector<40x32xf32>
    %30 = arith.mulf %7, %29 : vector<40x32xf32>
    %31 = arith.mulf %14, %14 : vector<16x32xf32>
    %cst_20 = arith.constant dense<0.000000e+00> : vector<16xf32>
    %32 = vector.multi_reduction <add>, %31, %cst_20 [1] : vector<16x32xf32> to vector<16xf32>
    %33 = vector.shape_cast %32 : vector<16xf32> to vector<16x1xf32>
    %cst_21 = arith.constant 1.000000e-24 : f32
    %34 = vector.broadcast %cst_21 : f32 to vector<16x1xf32>
    %35 = arith.maximumf %33, %34 : vector<16x1xf32>
    %36 = math.rsqrt %35 : vector<16x1xf32>
    %37 = vector.broadcast %36 : vector<16x1xf32> to vector<16x32xf32>
    %38 = arith.mulf %14, %37 : vector<16x32xf32>
    %cst_22 = arith.constant 1.000000e+00 : f32
    %39 = vector.broadcast %cst_22 : f32 to vector<24x32xf32>
    %40 = arith.mulf %22, %39 : vector<24x32xf32>
    %41 = arith.addf %1, %40 : vector<24x32xf32>
    %cst_23 = arith.constant 1.000000e+00 : f32
    %42 = vector.broadcast %cst_23 : f32 to vector<40x32xf32>
    %43 = arith.mulf %30, %42 : vector<40x32xf32>
    %44 = arith.addf %2, %43 : vector<40x32xf32>
    %cst_24 = arith.constant 1.000000e+00 : f32
    %45 = vector.broadcast %cst_24 : f32 to vector<16x32xf32>
    %46 = arith.mulf %38, %45 : vector<16x32xf32>
    %47 = arith.addf %0, %46 : vector<16x32xf32>
    %48 = arith.truncf %38 : vector<16x32xf32> to vector<16x32xbf16>
    %c0_25 = arith.constant 0 : index
    %c0_26 = arith.constant 0 : index
    %49 = vector.load %arg4[%c0_25, %c0_26] : memref<24x16xbf16, #tpu.memory_space<vmem>>, vector<24x16xbf16>
    %cst_27 = arith.constant dense<0.000000e+00> : vector<24x32xf32>
    %50 = tpu.matmul %49, %48, %cst_27 {dimension_numbers = #tpu.dot_dimension_numbers<[1], [0], [0], [1], [0, 0, 1, 1], [], []>} : vector<24x16xbf16>, vector<16x32xbf16>, vector<24x32xf32> -> vector<24x32xf32>
    %c0_28 = arith.constant 0 : index
    %c0_29 = arith.constant 0 : index
    %51 = vector.load %arg5[%c0_28, %c0_29] : memref<40x16xbf16, #tpu.memory_space<vmem>>, vector<40x16xbf16>
    %cst_30 = arith.constant dense<0.000000e+00> : vector<40x32xf32>
    %52 = tpu.matmul %51, %48, %cst_30 {dimension_numbers = #tpu.dot_dimension_numbers<[1], [0], [0], [1], [0, 0, 1, 1], [], []>} : vector<40x16xbf16>, vector<16x32xbf16>, vector<40x32xf32> -> vector<40x32xf32>
    %c0_31 = arith.constant 0 : index
    %c0_32 = arith.constant 0 : index
    %53 = vector.load %arg6[%c0_31, %c0_32] : memref<16x24xbf16, #tpu.memory_space<vmem>>, vector<16x24xbf16>
    %54 = arith.truncf %50 : vector<24x32xf32> to vector<24x32xbf16>
    %cst_33 = arith.constant dense<0.000000e+00> : vector<16x32xf32>
    %55 = tpu.matmul %53, %54, %cst_33 {dimension_numbers = #tpu.dot_dimension_numbers<[1], [0], [0], [1], [0, 0, 1, 1], [], []>} : vector<16x24xbf16>, vector<24x32xbf16>, vector<16x32xf32> -> vector<16x32xf32>
    %c0_34 = arith.constant 0 : index
    %c0_35 = arith.constant 0 : index
    %56 = vector.load %arg7[%c0_34, %c0_35] : memref<16x40xbf16, #tpu.memory_space<vmem>>, vector<16x40xbf16>
    %57 = arith.truncf %52 : vector<40x32xf32> to vector<40x32xbf16>
    %cst_36 = arith.constant dense<0.000000e+00> : vector<16x32xf32>
    %58 = tpu.matmul %56, %57, %cst_36 {dimension_numbers = #tpu.dot_dimension_numbers<[1], [0], [0], [1], [0, 0, 1, 1], [], []>} : vector<16x40xbf16>, vector<40x32xbf16>, vector<16x32xf32> -> vector<16x32xf32>
    %59 = arith.addf %55, %58 : vector<16x32xf32>
    %60 = arith.mulf %50, %50 : vector<24x32xf32>
    %cst_37 = arith.constant dense<0.000000e+00> : vector<24xf32>
    %61 = vector.multi_reduction <add>, %60, %cst_37 [1] : vector<24x32xf32> to vector<24xf32>
    %62 = vector.shape_cast %61 : vector<24xf32> to vector<24x1xf32>
    %cst_38 = arith.constant 1.000000e-24 : f32
    %63 = vector.broadcast %cst_38 : f32 to vector<24x1xf32>
    %64 = arith.maximumf %62, %63 : vector<24x1xf32>
    %65 = math.rsqrt %64 : vector<24x1xf32>
    %66 = vector.broadcast %65 : vector<24x1xf32> to vector<24x32xf32>
    %67 = arith.mulf %50, %66 : vector<24x32xf32>
    %68 = arith.mulf %52, %52 : vector<40x32xf32>
    %cst_39 = arith.constant dense<0.000000e+00> : vector<40xf32>
    %69 = vector.multi_reduction <add>, %68, %cst_39 [1] : vector<40x32xf32> to vector<40xf32>
    %70 = vector.shape_cast %69 : vector<40xf32> to vector<40x1xf32>
    %cst_40 = arith.constant 1.000000e-24 : f32
    %71 = vector.broadcast %cst_40 : f32 to vector<40x1xf32>
    %72 = arith.maximumf %70, %71 : vector<40x1xf32>
    %73 = math.rsqrt %72 : vector<40x1xf32>
    %74 = vector.broadcast %73 : vector<40x1xf32> to vector<40x32xf32>
    %75 = arith.mulf %52, %74 : vector<40x32xf32>
    %76 = arith.mulf %59, %59 : vector<16x32xf32>
    %cst_41 = arith.constant dense<0.000000e+00> : vector<16xf32>
    %77 = vector.multi_reduction <add>, %76, %cst_41 [1] : vector<16x32xf32> to vector<16xf32>
    %78 = vector.shape_cast %77 : vector<16xf32> to vector<16x1xf32>
    %cst_42 = arith.constant 1.000000e-24 : f32
    %79 = vector.broadcast %cst_42 : f32 to vector<16x1xf32>
    %80 = arith.maximumf %78, %79 : vector<16x1xf32>
    %81 = math.rsqrt %80 : vector<16x1xf32>
    %82 = vector.broadcast %81 : vector<16x1xf32> to vector<16x32xf32>
    %83 = arith.mulf %59, %82 : vector<16x32xf32>
    %cst_43 = arith.constant 5.000000e-01 : f32
    %84 = vector.broadcast %cst_43 : f32 to vector<24x32xf32>
    %85 = arith.mulf %67, %84 : vector<24x32xf32>
    %86 = arith.addf %41, %85 : vector<24x32xf32>
    %cst_44 = arith.constant 5.000000e-01 : f32
    %87 = vector.broadcast %cst_44 : f32 to vector<40x32xf32>
    %88 = arith.mulf %75, %87 : vector<40x32xf32>
    %89 = arith.addf %44, %88 : vector<40x32xf32>
    %cst_45 = arith.constant 5.000000e-01 : f32
    %90 = vector.broadcast %cst_45 : f32 to vector<16x32xf32>
    %91 = arith.mulf %83, %90 : vector<16x32xf32>
    %92 = arith.addf %47, %91 : vector<16x32xf32>
    %c0_46 = arith.constant 0 : index
    %c0_47 = arith.constant 0 : index
    %93 = vector.load %arg14[%c0_46, %c0_47] : memref<24x32xf32, #tpu.memory_space<vmem>>, vector<24x32xf32>
    tpu.vector_store %arg14[%c0_46, %c0_47], %86 {strides = array<i32>} : memref<24x32xf32, #tpu.memory_space<vmem>>, vector<24x32xf32>,
    %c0_48 = arith.constant 0 : index
    %c0_49 = arith.constant 0 : index
    %94 = vector.load %arg15[%c0_48, %c0_49] : memref<40x32xf32, #tpu.memory_space<vmem>>, vector<40x32xf32>
    tpu.vector_store %arg15[%c0_48, %c0_49], %89 {strides = array<i32>} : memref<40x32xf32, #tpu.memory_space<vmem>>, vector<40x32xf32>,
    %c0_50 = arith.constant 0 : index
    %c0_51 = arith.constant 0 : index
    %95 = vector.load %arg16[%c0_50, %c0_51] : memref<16x32xf32, #tpu.memory_space<vmem>>, vector<16x32xf32>
    tpu.vector_store %arg16[%c0_50, %c0_51], %92 {strides = array<i32>} : memref<16x32xf32, #tpu.memory_space<vmem>>, vector<16x32xf32>,
    %c0_52 = arith.constant 0 : index
    %96 = memref.load %arg0[%c0_52] : memref<8xi32, #tpu.memory_space<smem>>
    %97 = arith.index_cast %96 : i32 to index
    %c0_53 = arith.constant 0 : index
    %98 = vector.load %arg14[%97, %c0_53] : memref<24x32xf32, #tpu.memory_space<vmem>>, vector<1x32xf32>
    %c0_54 = arith.constant 0 : index
    %c0_55 = arith.constant 0 : index
    %99 = vector.load %arg17[%c0_54, %c0_55] : memref<8x32xf32, #tpu.memory_space<vmem>>, vector<1x32xf32>
    tpu.vector_store %arg17[%c0_54, %c0_55], %98 {strides = array<i32>} : memref<8x32xf32, #tpu.memory_space<vmem>>, vector<1x32xf32>,
    %c0_56 = arith.constant 0 : index
    %100 = memref.load %arg1[%c0_56] : memref<8xi32, #tpu.memory_space<smem>>
    %101 = arith.index_cast %100 : i32 to index
    %c0_57 = arith.constant 0 : index
    %102 = vector.load %arg15[%101, %c0_57] : memref<40x32xf32, #tpu.memory_space<vmem>>, vector<1x32xf32>
    %c0_58 = arith.constant 0 : index
    %c0_59 = arith.constant 0 : index
    %103 = vector.load %arg18[%c0_58, %c0_59] : memref<8x32xf32, #tpu.memory_space<vmem>>, vector<1x32xf32>
    tpu.vector_store %arg18[%c0_58, %c0_59], %102 {strides = array<i32>} : memref<8x32xf32, #tpu.memory_space<vmem>>, vector<1x32xf32>,
    %c0_60 = arith.constant 0 : index
    %104 = memref.load %arg3[%c0_60] : memref<8xi32, #tpu.memory_space<smem>>
    %105 = arith.index_cast %104 : i32 to index
    %c0_61 = arith.constant 0 : index
    %106 = vector.load %arg16[%105, %c0_61] : memref<16x32xf32, #tpu.memory_space<vmem>>, vector<1x32xf32>
    %c0_62 = arith.constant 0 : index
    %c0_63 = arith.constant 0 : index
    %107 = vector.load %arg19[%c0_62, %c0_63] : memref<8x32xf32, #tpu.memory_space<vmem>>, vector<1x32xf32>
    tpu.vector_store %arg19[%c0_62, %c0_63], %106 {strides = array<i32>} : memref<8x32xf32, #tpu.memory_space<vmem>>, vector<1x32xf32>,
    %108 = arith.index_cast %96 : i32 to index
    %c0_64 = arith.constant 0 : index
    %109 = vector.load %arg8[%108, %c0_64] : memref<24x32xf32, #tpu.memory_space<vmem>>, vector<1x32xf32>
    %c0_65 = arith.constant 0 : index
    %c0_66 = arith.constant 0 : index
    %110 = vector.load %arg20[%c0_65, %c0_66] : memref<8x32xf32, #tpu.memory_space<vmem>>, vector<1x32xf32>
    tpu.vector_store %arg20[%c0_65, %c0_66], %109 {strides = array<i32>} : memref<8x32xf32, #tpu.memory_space<vmem>>, vector<1x32xf32>,
    %c0_67 = arith.constant 0 : index
    %111 = memref.load %arg2[%c0_67] : memref<32xi32, #tpu.memory_space<smem>>
    %112 = arith.index_cast %111 : i32 to index
    %c0_68 = arith.constant 0 : index
    %113 = vector.load %arg15[%112, %c0_68] : memref<40x32xf32, #tpu.memory_space<vmem>>, vector<1x32xf32>
    %c0_69 = arith.constant 0 : index
    %c0_70 = arith.constant 0 : index
    %114 = vector.load %arg22[%c0_69, %c0_70] : memref<32x32xf32, #tpu.memory_space<vmem>>, vector<1x32xf32>
    tpu.vector_store %arg22[%c0_69, %c0_70], %113 {strides = array<i32>} : memref<32x32xf32, #tpu.memory_space<vmem>>, vector<1x32xf32>,
    %c1 = arith.constant 1 : index
    %115 = memref.load %arg2[%c1] : memref<32xi32, #tpu.memory_space<smem>>
    %116 = arith.index_cast %115 : i32 to index
    %c0_71 = arith.constant 0 : index
    %117 = vector.load %arg15[%116, %c0_71] : memref<40x32xf32, #tpu.memory_space<vmem>>, vector<1x32xf32>
    %c1_72 = arith.constant 1 : index
    %c0_73 = arith.constant 0 : index
    %118 = vector.load %arg22[%c1_72, %c0_73] : memref<32x32xf32, #tpu.memory_space<vmem>>, vector<1x32xf32>
    tpu.vector_store %arg22[%c1_72, %c0_73], %117 {strides = array<i32>} : memref<32x32xf32, #tpu.memory_space<vmem>>, vector<1x32xf32>,
    %119 = arith.addf %113, %117 : vector<1x32xf32>
    %c2 = arith.constant 2 : index
    %120 = memref.load %arg2[%c2] : memref<32xi32, #tpu.memory_space<smem>>
    %121 = arith.index_cast %120 : i32 to index
    %c0_74 = arith.constant 0 : index
    %122 = vector.load %arg15[%121, %c0_74] : memref<40x32xf32, #tpu.memory_space<vmem>>, vector<1x32xf32>
    %c2_75 = arith.constant 2 : index
    %c0_76 = arith.constant 0 : index
    %123 = vector.load %arg22[%c2_75, %c0_76] : memref<32x32xf32, #tpu.memory_space<vmem>>, vector<1x32xf32>
    tpu.vector_store %arg22[%c2_75, %c0_76], %122 {strides = array<i32>} : memref<32x32xf32, #tpu.memory_space<vmem>>, vector<1x32xf32>,
    %124 = arith.addf %119, %122 : vector<1x32xf32>
    %c3 = arith.constant 3 : index
    %125 = memref.load %arg2[%c3] : memref<32xi32, #tpu.memory_space<smem>>
    %126 = arith.index_cast %125 : i32 to index
    %c0_77 = arith.constant 0 : index
    %127 = vector.load %arg15[%126, %c0_77] : memref<40x32xf32, #tpu.memory_space<vmem>>, vector<1x32xf32>
    %c3_78 = arith.constant 3 : index
    %c0_79 = arith.constant 0 : index
    %128 = vector.load %arg22[%c3_78, %c0_79] : memref<32x32xf32, #tpu.memory_space<vmem>>, vector<1x32xf32>
    tpu.vector_store %arg22[%c3_78, %c0_79], %127 {strides = array<i32>} : memref<32x32xf32, #tpu.memory_space<vmem>>, vector<1x32xf32>,
    %129 = arith.addf %124, %127 : vector<1x32xf32>
    %cst_80 = arith.constant 2.500000e-01 : f32
    %130 = vector.broadcast %cst_80 : f32 to vector<1x32xf32>
    %131 = arith.mulf %129, %130 : vector<1x32xf32>
    %c0_81 = arith.constant 0 : index
    %c0_82 = arith.constant 0 : index
    %132 = vector.load %arg21[%c0_81, %c0_82] : memref<8x32xf32, #tpu.memory_space<vmem>>, vector<1x32xf32>
    tpu.vector_store %arg21[%c0_81, %c0_82], %131 {strides = array<i32>} : memref<8x32xf32, #tpu.memory_space<vmem>>, vector<1x32xf32>,
    %c1_83 = arith.constant 1 : index
    %133 = memref.load %arg0[%c1_83] : memref<8xi32, #tpu.memory_space<smem>>
    %134 = arith.index_cast %133 : i32 to index
    %c0_84 = arith.constant 0 : index
    %135 = vector.load %arg14[%134, %c0_84] : memref<24x32xf32, #tpu.memory_space<vmem>>, vector<1x32xf32>
    %c1_85 = arith.constant 1 : index
    %c0_86 = arith.constant 0 : index
    %136 = vector.load %arg17[%c1_85, %c0_86] : memref<8x32xf32, #tpu.memory_space<vmem>>, vector<1x32xf32>
    tpu.vector_store %arg17[%c1_85, %c0_86], %135 {strides = array<i32>} : memref<8x32xf32, #tpu.memory_space<vmem>>, vector<1x32xf32>,
    %c1_87 = arith.constant 1 : index
    %137 = memref.load %arg1[%c1_87] : memref<8xi32, #tpu.memory_space<smem>>
    %138 = arith.index_cast %137 : i32 to index
    %c0_88 = arith.constant 0 : index
    %139 = vector.load %arg15[%138, %c0_88] : memref<40x32xf32, #tpu.memory_space<vmem>>, vector<1x32xf32>
    %c1_89 = arith.constant 1 : index
    %c0_90 = arith.constant 0 : index
    %140 = vector.load %arg18[%c1_89, %c0_90] : memref<8x32xf32, #tpu.memory_space<vmem>>, vector<1x32xf32>
    tpu.vector_store %arg18[%c1_89, %c0_90], %139 {strides = array<i32>} : memref<8x32xf32, #tpu.memory_space<vmem>>, vector<1x32xf32>,
    %c1_91 = arith.constant 1 : index
    %141 = memref.load %arg3[%c1_91] : memref<8xi32, #tpu.memory_space<smem>>
    %142 = arith.index_cast %141 : i32 to index
    %c0_92 = arith.constant 0 : index
    %143 = vector.load %arg16[%142, %c0_92] : memref<16x32xf32, #tpu.memory_space<vmem>>, vector<1x32xf32>
    %c1_93 = arith.constant 1 : index
    %c0_94 = arith.constant 0 : index
    %144 = vector.load %arg19[%c1_93, %c0_94] : memref<8x32xf32, #tpu.memory_space<vmem>>, vector<1x32xf32>
    tpu.vector_store %arg19[%c1_93, %c0_94], %143 {strides = array<i32>} : memref<8x32xf32, #tpu.memory_space<vmem>>, vector<1x32xf32>,
    %145 = arith.index_cast %133 : i32 to index
    %c0_95 = arith.constant 0 : index
    %146 = vector.load %arg8[%145, %c0_95] : memref<24x32xf32, #tpu.memory_space<vmem>>, vector<1x32xf32>
    %c1_96 = arith.constant 1 : index
    %c0_97 = arith.constant 0 : index
    %147 = vector.load %arg20[%c1_96, %c0_97] : memref<8x32xf32, #tpu.memory_space<vmem>>, vector<1x32xf32>
    tpu.vector_store %arg20[%c1_96, %c0_97], %146 {strides = array<i32>} : memref<8x32xf32, #tpu.memory_space<vmem>>, vector<1x32xf32>,
    %c4 = arith.constant 4 : index
    %148 = memref.load %arg2[%c4] : memref<32xi32, #tpu.memory_space<smem>>
    %149 = arith.index_cast %148 : i32 to index
    %c0_98 = arith.constant 0 : index
    %150 = vector.load %arg15[%149, %c0_98] : memref<40x32xf32, #tpu.memory_space<vmem>>, vector<1x32xf32>
    %c4_99 = arith.constant 4 : index
    %c0_100 = arith.constant 0 : index
    %151 = vector.load %arg22[%c4_99, %c0_100] : memref<32x32xf32, #tpu.memory_space<vmem>>, vector<1x32xf32>
    tpu.vector_store %arg22[%c4_99, %c0_100], %150 {strides = array<i32>} : memref<32x32xf32, #tpu.memory_space<vmem>>, vector<1x32xf32>,
    %c5 = arith.constant 5 : index
    %152 = memref.load %arg2[%c5] : memref<32xi32, #tpu.memory_space<smem>>
    %153 = arith.index_cast %152 : i32 to index
    %c0_101 = arith.constant 0 : index
    %154 = vector.load %arg15[%153, %c0_101] : memref<40x32xf32, #tpu.memory_space<vmem>>, vector<1x32xf32>
    %c5_102 = arith.constant 5 : index
    %c0_103 = arith.constant 0 : index
    %155 = vector.load %arg22[%c5_102, %c0_103] : memref<32x32xf32, #tpu.memory_space<vmem>>, vector<1x32xf32>
    tpu.vector_store %arg22[%c5_102, %c0_103], %154 {strides = array<i32>} : memref<32x32xf32, #tpu.memory_space<vmem>>, vector<1x32xf32>,
    %156 = arith.addf %150, %154 : vector<1x32xf32>
    %c6 = arith.constant 6 : index
    %157 = memref.load %arg2[%c6] : memref<32xi32, #tpu.memory_space<smem>>
    %158 = arith.index_cast %157 : i32 to index
    %c0_104 = arith.constant 0 : index
    %159 = vector.load %arg15[%158, %c0_104] : memref<40x32xf32, #tpu.memory_space<vmem>>, vector<1x32xf32>
    %c6_105 = arith.constant 6 : index
    %c0_106 = arith.constant 0 : index
    %160 = vector.load %arg22[%c6_105, %c0_106] : memref<32x32xf32, #tpu.memory_space<vmem>>, vector<1x32xf32>
    tpu.vector_store %arg22[%c6_105, %c0_106], %159 {strides = array<i32>} : memref<32x32xf32, #tpu.memory_space<vmem>>, vector<1x32xf32>,
    %161 = arith.addf %156, %159 : vector<1x32xf32>
    %c7 = arith.constant 7 : index
    %162 = memref.load %arg2[%c7] : memref<32xi32, #tpu.memory_space<smem>>
    %163 = arith.index_cast %162 : i32 to index
    %c0_107 = arith.constant 0 : index
    %164 = vector.load %arg15[%163, %c0_107] : memref<40x32xf32, #tpu.memory_space<vmem>>, vector<1x32xf32>
    %c7_108 = arith.constant 7 : index
    %c0_109 = arith.constant 0 : index
    %165 = vector.load %arg22[%c7_108, %c0_109] : memref<32x32xf32, #tpu.memory_space<vmem>>, vector<1x32xf32>
    tpu.vector_store %arg22[%c7_108, %c0_109], %164 {strides = array<i32>} : memref<32x32xf32, #tpu.memory_space<vmem>>, vector<1x32xf32>,
    %166 = arith.addf %161, %164 : vector<1x32xf32>
    %cst_110 = arith.constant 2.500000e-01 : f32
    %167 = vector.broadcast %cst_110 : f32 to vector<1x32xf32>
    %168 = arith.mulf %166, %167 : vector<1x32xf32>
    %c1_111 = arith.constant 1 : index
    %c0_112 = arith.constant 0 : index
    %169 = vector.load %arg21[%c1_111, %c0_112] : memref<8x32xf32, #tpu.memory_space<vmem>>, vector<1x32xf32>
    tpu.vector_store %arg21[%c1_111, %c0_112], %168 {strides = array<i32>} : memref<8x32xf32, #tpu.memory_space<vmem>>, vector<1x32xf32>,
    %c2_113 = arith.constant 2 : index
    %170 = memref.load %arg0[%c2_113] : memref<8xi32, #tpu.memory_space<smem>>
    %171 = arith.index_cast %170 : i32 to index
    %c0_114 = arith.constant 0 : index
    %172 = vector.load %arg14[%171, %c0_114] : memref<24x32xf32, #tpu.memory_space<vmem>>, vector<1x32xf32>
    %c2_115 = arith.constant 2 : index
    %c0_116 = arith.constant 0 : index
    %173 = vector.load %arg17[%c2_115, %c0_116] : memref<8x32xf32, #tpu.memory_space<vmem>>, vector<1x32xf32>
    tpu.vector_store %arg17[%c2_115, %c0_116], %172 {strides = array<i32>} : memref<8x32xf32, #tpu.memory_space<vmem>>, vector<1x32xf32>,
    %c2_117 = arith.constant 2 : index
    %174 = memref.load %arg1[%c2_117] : memref<8xi32, #tpu.memory_space<smem>>
    %175 = arith.index_cast %174 : i32 to index
    %c0_118 = arith.constant 0 : index
    %176 = vector.load %arg15[%175, %c0_118] : memref<40x32xf32, #tpu.memory_space<vmem>>, vector<1x32xf32>
    %c2_119 = arith.constant 2 : index
    %c0_120 = arith.constant 0 : index
    %177 = vector.load %arg18[%c2_119, %c0_120] : memref<8x32xf32, #tpu.memory_space<vmem>>, vector<1x32xf32>
    tpu.vector_store %arg18[%c2_119, %c0_120], %176 {strides = array<i32>} : memref<8x32xf32, #tpu.memory_space<vmem>>, vector<1x32xf32>,
    %c2_121 = arith.constant 2 : index
    %178 = memref.load %arg3[%c2_121] : memref<8xi32, #tpu.memory_space<smem>>
    %179 = arith.index_cast %178 : i32 to index
    %c0_122 = arith.constant 0 : index
    %180 = vector.load %arg16[%179, %c0_122] : memref<16x32xf32, #tpu.memory_space<vmem>>, vector<1x32xf32>
    %c2_123 = arith.constant 2 : index
    %c0_124 = arith.constant 0 : index
    %181 = vector.load %arg19[%c2_123, %c0_124] : memref<8x32xf32, #tpu.memory_space<vmem>>, vector<1x32xf32>
    tpu.vector_store %arg19[%c2_123, %c0_124], %180 {strides = array<i32>} : memref<8x32xf32, #tpu.memory_space<vmem>>, vector<1x32xf32>,
    %182 = arith.index_cast %170 : i32 to index
    %c0_125 = arith.constant 0 : index
    %183 = vector.load %arg8[%182, %c0_125] : memref<24x32xf32, #tpu.memory_space<vmem>>, vector<1x32xf32>
    %c2_126 = arith.constant 2 : index
    %c0_127 = arith.constant 0 : index
    %184 = vector.load %arg20[%c2_126, %c0_127] : memref<8x32xf32, #tpu.memory_space<vmem>>, vector<1x32xf32>
    tpu.vector_store %arg20[%c2_126, %c0_127], %183 {strides = array<i32>} : memref<8x32xf32, #tpu.memory_space<vmem>>, vector<1x32xf32>,
    %c8 = arith.constant 8 : index
    %185 = memref.load %arg2[%c8] : memref<32xi32, #tpu.memory_space<smem>>
    %186 = arith.index_cast %185 : i32 to index
    %c0_128 = arith.constant 0 : index
    %187 = vector.load %arg15[%186, %c0_128] : memref<40x32xf32, #tpu.memory_space<vmem>>, vector<1x32xf32>
    %c8_129 = arith.constant 8 : index
    %c0_130 = arith.constant 0 : index
    %188 = vector.load %arg22[%c8_129, %c0_130] : memref<32x32xf32, #tpu.memory_space<vmem>>, vector<1x32xf32>
    tpu.vector_store %arg22[%c8_129, %c0_130], %187 {strides = array<i32>} : memref<32x32xf32, #tpu.memory_space<vmem>>, vector<1x32xf32>,
    %c9 = arith.constant 9 : index
    %189 = memref.load %arg2[%c9] : memref<32xi32, #tpu.memory_space<smem>>
    %190 = arith.index_cast %189 : i32 to index
    %c0_131 = arith.constant 0 : index
    %191 = vector.load %arg15[%190, %c0_131] : memref<40x32xf32, #tpu.memory_space<vmem>>, vector<1x32xf32>
    %c9_132 = arith.constant 9 : index
    %c0_133 = arith.constant 0 : index
    %192 = vector.load %arg22[%c9_132, %c0_133] : memref<32x32xf32, #tpu.memory_space<vmem>>, vector<1x32xf32>
    tpu.vector_store %arg22[%c9_132, %c0_133], %191 {strides = array<i32>} : memref<32x32xf32, #tpu.memory_space<vmem>>, vector<1x32xf32>,
    %193 = arith.addf %187, %191 : vector<1x32xf32>
    %c10 = arith.constant 10 : index
    %194 = memref.load %arg2[%c10] : memref<32xi32, #tpu.memory_space<smem>>
    %195 = arith.index_cast %194 : i32 to index
    %c0_134 = arith.constant 0 : index
    %196 = vector.load %arg15[%195, %c0_134] : memref<40x32xf32, #tpu.memory_space<vmem>>, vector<1x32xf32>
    %c10_135 = arith.constant 10 : index
    %c0_136 = arith.constant 0 : index
    %197 = vector.load %arg22[%c10_135, %c0_136] : memref<32x32xf32, #tpu.memory_space<vmem>>, vector<1x32xf32>
    tpu.vector_store %arg22[%c10_135, %c0_136], %196 {strides = array<i32>} : memref<32x32xf32, #tpu.memory_space<vmem>>, vector<1x32xf32>,
    %198 = arith.addf %193, %196 : vector<1x32xf32>
    %c11 = arith.constant 11 : index
    %199 = memref.load %arg2[%c11] : memref<32xi32, #tpu.memory_space<smem>>
    %200 = arith.index_cast %199 : i32 to index
    %c0_137 = arith.constant 0 : index
    %201 = vector.load %arg15[%200, %c0_137] : memref<40x32xf32, #tpu.memory_space<vmem>>, vector<1x32xf32>
    %c11_138 = arith.constant 11 : index
    %c0_139 = arith.constant 0 : index
    %202 = vector.load %arg22[%c11_138, %c0_139] : memref<32x32xf32, #tpu.memory_space<vmem>>, vector<1x32xf32>
    tpu.vector_store %arg22[%c11_138, %c0_139], %201 {strides = array<i32>} : memref<32x32xf32, #tpu.memory_space<vmem>>, vector<1x32xf32>,
    %203 = arith.addf %198, %201 : vector<1x32xf32>
    %cst_140 = arith.constant 2.500000e-01 : f32
    %204 = vector.broadcast %cst_140 : f32 to vector<1x32xf32>
    %205 = arith.mulf %203, %204 : vector<1x32xf32>
    %c2_141 = arith.constant 2 : index
    %c0_142 = arith.constant 0 : index
    %206 = vector.load %arg21[%c2_141, %c0_142] : memref<8x32xf32, #tpu.memory_space<vmem>>, vector<1x32xf32>
    tpu.vector_store %arg21[%c2_141, %c0_142], %205 {strides = array<i32>} : memref<8x32xf32, #tpu.memory_space<vmem>>, vector<1x32xf32>,
    %c3_143 = arith.constant 3 : index
    %207 = memref.load %arg0[%c3_143] : memref<8xi32, #tpu.memory_space<smem>>
    %208 = arith.index_cast %207 : i32 to index
    %c0_144 = arith.constant 0 : index
    %209 = vector.load %arg14[%208, %c0_144] : memref<24x32xf32, #tpu.memory_space<vmem>>, vector<1x32xf32>
    %c3_145 = arith.constant 3 : index
    %c0_146 = arith.constant 0 : index
    %210 = vector.load %arg17[%c3_145, %c0_146] : memref<8x32xf32, #tpu.memory_space<vmem>>, vector<1x32xf32>
    tpu.vector_store %arg17[%c3_145, %c0_146], %209 {strides = array<i32>} : memref<8x32xf32, #tpu.memory_space<vmem>>, vector<1x32xf32>,
    %c3_147 = arith.constant 3 : index
    %211 = memref.load %arg1[%c3_147] : memref<8xi32, #tpu.memory_space<smem>>
    %212 = arith.index_cast %211 : i32 to index
    %c0_148 = arith.constant 0 : index
    %213 = vector.load %arg15[%212, %c0_148] : memref<40x32xf32, #tpu.memory_space<vmem>>, vector<1x32xf32>
    %c3_149 = arith.constant 3 : index
    %c0_150 = arith.constant 0 : index
    %214 = vector.load %arg18[%c3_149, %c0_150] : memref<8x32xf32, #tpu.memory_space<vmem>>, vector<1x32xf32>
    tpu.vector_store %arg18[%c3_149, %c0_150], %213 {strides = array<i32>} : memref<8x32xf32, #tpu.memory_space<vmem>>, vector<1x32xf32>,
    %c3_151 = arith.constant 3 : index
    %215 = memref.load %arg3[%c3_151] : memref<8xi32, #tpu.memory_space<smem>>
    %216 = arith.index_cast %215 : i32 to index
    %c0_152 = arith.constant 0 : index
    %217 = vector.load %arg16[%216, %c0_152] : memref<16x32xf32, #tpu.memory_space<vmem>>, vector<1x32xf32>
    %c3_153 = arith.constant 3 : index
    %c0_154 = arith.constant 0 : index
    %218 = vector.load %arg19[%c3_153, %c0_154] : memref<8x32xf32, #tpu.memory_space<vmem>>, vector<1x32xf32>
    tpu.vector_store %arg19[%c3_153, %c0_154], %217 {strides = array<i32>} : memref<8x32xf32, #tpu.memory_space<vmem>>, vector<1x32xf32>,
    %219 = arith.index_cast %207 : i32 to index
    %c0_155 = arith.constant 0 : index
    %220 = vector.load %arg8[%219, %c0_155] : memref<24x32xf32, #tpu.memory_space<vmem>>, vector<1x32xf32>
    %c3_156 = arith.constant 3 : index
    %c0_157 = arith.constant 0 : index
    %221 = vector.load %arg20[%c3_156, %c0_157] : memref<8x32xf32, #tpu.memory_space<vmem>>, vector<1x32xf32>
    tpu.vector_store %arg20[%c3_156, %c0_157], %220 {strides = array<i32>} : memref<8x32xf32, #tpu.memory_space<vmem>>, vector<1x32xf32>,
    %c12 = arith.constant 12 : index
    %222 = memref.load %arg2[%c12] : memref<32xi32, #tpu.memory_space<smem>>
    %223 = arith.index_cast %222 : i32 to index
    %c0_158 = arith.constant 0 : index
    %224 = vector.load %arg15[%223, %c0_158] : memref<40x32xf32, #tpu.memory_space<vmem>>, vector<1x32xf32>
    %c12_159 = arith.constant 12 : index
    %c0_160 = arith.constant 0 : index
    %225 = vector.load %arg22[%c12_159, %c0_160] : memref<32x32xf32, #tpu.memory_space<vmem>>, vector<1x32xf32>
    tpu.vector_store %arg22[%c12_159, %c0_160], %224 {strides = array<i32>} : memref<32x32xf32, #tpu.memory_space<vmem>>, vector<1x32xf32>,
    %c13 = arith.constant 13 : index
    %226 = memref.load %arg2[%c13] : memref<32xi32, #tpu.memory_space<smem>>
    %227 = arith.index_cast %226 : i32 to index
    %c0_161 = arith.constant 0 : index
    %228 = vector.load %arg15[%227, %c0_161] : memref<40x32xf32, #tpu.memory_space<vmem>>, vector<1x32xf32>
    %c13_162 = arith.constant 13 : index
    %c0_163 = arith.constant 0 : index
    %229 = vector.load %arg22[%c13_162, %c0_163] : memref<32x32xf32, #tpu.memory_space<vmem>>, vector<1x32xf32>
    tpu.vector_store %arg22[%c13_162, %c0_163], %228 {strides = array<i32>} : memref<32x32xf32, #tpu.memory_space<vmem>>, vector<1x32xf32>,
    %230 = arith.addf %224, %228 : vector<1x32xf32>
    %c14 = arith.constant 14 : index
    %231 = memref.load %arg2[%c14] : memref<32xi32, #tpu.memory_space<smem>>
    %232 = arith.index_cast %231 : i32 to index
    %c0_164 = arith.constant 0 : index
    %233 = vector.load %arg15[%232, %c0_164] : memref<40x32xf32, #tpu.memory_space<vmem>>, vector<1x32xf32>
    %c14_165 = arith.constant 14 : index
    %c0_166 = arith.constant 0 : index
    %234 = vector.load %arg22[%c14_165, %c0_166] : memref<32x32xf32, #tpu.memory_space<vmem>>, vector<1x32xf32>
    tpu.vector_store %arg22[%c14_165, %c0_166], %233 {strides = array<i32>} : memref<32x32xf32, #tpu.memory_space<vmem>>, vector<1x32xf32>,
    %235 = arith.addf %230, %233 : vector<1x32xf32>
    %c15 = arith.constant 15 : index
    %236 = memref.load %arg2[%c15] : memref<32xi32, #tpu.memory_space<smem>>
    %237 = arith.index_cast %236 : i32 to index
    %c0_167 = arith.constant 0 : index
    %238 = vector.load %arg15[%237, %c0_167] : memref<40x32xf32, #tpu.memory_space<vmem>>, vector<1x32xf32>
    %c15_168 = arith.constant 15 : index
    %c0_169 = arith.constant 0 : index
    %239 = vector.load %arg22[%c15_168, %c0_169] : memref<32x32xf32, #tpu.memory_space<vmem>>, vector<1x32xf32>
    tpu.vector_store %arg22[%c15_168, %c0_169], %238 {strides = array<i32>} : memref<32x32xf32, #tpu.memory_space<vmem>>, vector<1x32xf32>,
    %240 = arith.addf %235, %238 : vector<1x32xf32>
    %cst_170 = arith.constant 2.500000e-01 : f32
    %241 = vector.broadcast %cst_170 : f32 to vector<1x32xf32>
    %242 = arith.mulf %240, %241 : vector<1x32xf32>
    %c3_171 = arith.constant 3 : index
    %c0_172 = arith.constant 0 : index
    %243 = vector.load %arg21[%c3_171, %c0_172] : memref<8x32xf32, #tpu.memory_space<vmem>>, vector<1x32xf32>
    tpu.vector_store %arg21[%c3_171, %c0_172], %242 {strides = array<i32>} : memref<8x32xf32, #tpu.memory_space<vmem>>, vector<1x32xf32>,
    %c4_173 = arith.constant 4 : index
    %244 = memref.load %arg0[%c4_173] : memref<8xi32, #tpu.memory_space<smem>>
    %245 = arith.index_cast %244 : i32 to index
    %c0_174 = arith.constant 0 : index
    %246 = vector.load %arg14[%245, %c0_174] : memref<24x32xf32, #tpu.memory_space<vmem>>, vector<1x32xf32>
    %c4_175 = arith.constant 4 : index
    %c0_176 = arith.constant 0 : index
    %247 = vector.load %arg17[%c4_175, %c0_176] : memref<8x32xf32, #tpu.memory_space<vmem>>, vector<1x32xf32>
    tpu.vector_store %arg17[%c4_175, %c0_176], %246 {strides = array<i32>} : memref<8x32xf32, #tpu.memory_space<vmem>>, vector<1x32xf32>,
    %c4_177 = arith.constant 4 : index
    %248 = memref.load %arg1[%c4_177] : memref<8xi32, #tpu.memory_space<smem>>
    %249 = arith.index_cast %248 : i32 to index
    %c0_178 = arith.constant 0 : index
    %250 = vector.load %arg15[%249, %c0_178] : memref<40x32xf32, #tpu.memory_space<vmem>>, vector<1x32xf32>
    %c4_179 = arith.constant 4 : index
    %c0_180 = arith.constant 0 : index
    %251 = vector.load %arg18[%c4_179, %c0_180] : memref<8x32xf32, #tpu.memory_space<vmem>>, vector<1x32xf32>
    tpu.vector_store %arg18[%c4_179, %c0_180], %250 {strides = array<i32>} : memref<8x32xf32, #tpu.memory_space<vmem>>, vector<1x32xf32>,
    %c4_181 = arith.constant 4 : index
    %252 = memref.load %arg3[%c4_181] : memref<8xi32, #tpu.memory_space<smem>>
    %253 = arith.index_cast %252 : i32 to index
    %c0_182 = arith.constant 0 : index
    %254 = vector.load %arg16[%253, %c0_182] : memref<16x32xf32, #tpu.memory_space<vmem>>, vector<1x32xf32>
    %c4_183 = arith.constant 4 : index
    %c0_184 = arith.constant 0 : index
    %255 = vector.load %arg19[%c4_183, %c0_184] : memref<8x32xf32, #tpu.memory_space<vmem>>, vector<1x32xf32>
    tpu.vector_store %arg19[%c4_183, %c0_184], %254 {strides = array<i32>} : memref<8x32xf32, #tpu.memory_space<vmem>>, vector<1x32xf32>,
    %256 = arith.index_cast %244 : i32 to index
    %c0_185 = arith.constant 0 : index
    %257 = vector.load %arg8[%256, %c0_185] : memref<24x32xf32, #tpu.memory_space<vmem>>, vector<1x32xf32>
    %c4_186 = arith.constant 4 : index
    %c0_187 = arith.constant 0 : index
    %258 = vector.load %arg20[%c4_186, %c0_187] : memref<8x32xf32, #tpu.memory_space<vmem>>, vector<1x32xf32>
    tpu.vector_store %arg20[%c4_186, %c0_187], %257 {strides = array<i32>} : memref<8x32xf32, #tpu.memory_space<vmem>>, vector<1x32xf32>,
    %c16 = arith.constant 16 : index
    %259 = memref.load %arg2[%c16] : memref<32xi32, #tpu.memory_space<smem>>
    %260 = arith.index_cast %259 : i32 to index
    %c0_188 = arith.constant 0 : index
    %261 = vector.load %arg15[%260, %c0_188] : memref<40x32xf32, #tpu.memory_space<vmem>>, vector<1x32xf32>
    %c16_189 = arith.constant 16 : index
    %c0_190 = arith.constant 0 : index
    %262 = vector.load %arg22[%c16_189, %c0_190] : memref<32x32xf32, #tpu.memory_space<vmem>>, vector<1x32xf32>
    tpu.vector_store %arg22[%c16_189, %c0_190], %261 {strides = array<i32>} : memref<32x32xf32, #tpu.memory_space<vmem>>, vector<1x32xf32>,
    %c17 = arith.constant 17 : index
    %263 = memref.load %arg2[%c17] : memref<32xi32, #tpu.memory_space<smem>>
    %264 = arith.index_cast %263 : i32 to index
    %c0_191 = arith.constant 0 : index
    %265 = vector.load %arg15[%264, %c0_191] : memref<40x32xf32, #tpu.memory_space<vmem>>, vector<1x32xf32>
    %c17_192 = arith.constant 17 : index
    %c0_193 = arith.constant 0 : index
    %266 = vector.load %arg22[%c17_192, %c0_193] : memref<32x32xf32, #tpu.memory_space<vmem>>, vector<1x32xf32>
    tpu.vector_store %arg22[%c17_192, %c0_193], %265 {strides = array<i32>} : memref<32x32xf32, #tpu.memory_space<vmem>>, vector<1x32xf32>,
    %267 = arith.addf %261, %265 : vector<1x32xf32>
    %c18 = arith.constant 18 : index
    %268 = memref.load %arg2[%c18] : memref<32xi32, #tpu.memory_space<smem>>
    %269 = arith.index_cast %268 : i32 to index
    %c0_194 = arith.constant 0 : index
    %270 = vector.load %arg15[%269, %c0_194] : memref<40x32xf32, #tpu.memory_space<vmem>>, vector<1x32xf32>
    %c18_195 = arith.constant 18 : index
    %c0_196 = arith.constant 0 : index
    %271 = vector.load %arg22[%c18_195, %c0_196] : memref<32x32xf32, #tpu.memory_space<vmem>>, vector<1x32xf32>
    tpu.vector_store %arg22[%c18_195, %c0_196], %270 {strides = array<i32>} : memref<32x32xf32, #tpu.memory_space<vmem>>, vector<1x32xf32>,
    %272 = arith.addf %267, %270 : vector<1x32xf32>
    %c19 = arith.constant 19 : index
    %273 = memref.load %arg2[%c19] : memref<32xi32, #tpu.memory_space<smem>>
    %274 = arith.index_cast %273 : i32 to index
    %c0_197 = arith.constant 0 : index
    %275 = vector.load %arg15[%274, %c0_197] : memref<40x32xf32, #tpu.memory_space<vmem>>, vector<1x32xf32>
    %c19_198 = arith.constant 19 : index
    %c0_199 = arith.constant 0 : index
    %276 = vector.load %arg22[%c19_198, %c0_199] : memref<32x32xf32, #tpu.memory_space<vmem>>, vector<1x32xf32>
    tpu.vector_store %arg22[%c19_198, %c0_199], %275 {strides = array<i32>} : memref<32x32xf32, #tpu.memory_space<vmem>>, vector<1x32xf32>,
    %277 = arith.addf %272, %275 : vector<1x32xf32>
    %cst_200 = arith.constant 2.500000e-01 : f32
    %278 = vector.broadcast %cst_200 : f32 to vector<1x32xf32>
    %279 = arith.mulf %277, %278 : vector<1x32xf32>
    %c4_201 = arith.constant 4 : index
    %c0_202 = arith.constant 0 : index
    %280 = vector.load %arg21[%c4_201, %c0_202] : memref<8x32xf32, #tpu.memory_space<vmem>>, vector<1x32xf32>
    tpu.vector_store %arg21[%c4_201, %c0_202], %279 {strides = array<i32>} : memref<8x32xf32, #tpu.memory_space<vmem>>, vector<1x32xf32>,
    %c5_203 = arith.constant 5 : index
    %281 = memref.load %arg0[%c5_203] : memref<8xi32, #tpu.memory_space<smem>>
    %282 = arith.index_cast %281 : i32 to index
    %c0_204 = arith.constant 0 : index
    %283 = vector.load %arg14[%282, %c0_204] : memref<24x32xf32, #tpu.memory_space<vmem>>, vector<1x32xf32>
    %c5_205 = arith.constant 5 : index
    %c0_206 = arith.constant 0 : index
    %284 = vector.load %arg17[%c5_205, %c0_206] : memref<8x32xf32, #tpu.memory_space<vmem>>, vector<1x32xf32>
    tpu.vector_store %arg17[%c5_205, %c0_206], %283 {strides = array<i32>} : memref<8x32xf32, #tpu.memory_space<vmem>>, vector<1x32xf32>,
    %c5_207 = arith.constant 5 : index
    %285 = memref.load %arg1[%c5_207] : memref<8xi32, #tpu.memory_space<smem>>
    %286 = arith.index_cast %285 : i32 to index
    %c0_208 = arith.constant 0 : index
    %287 = vector.load %arg15[%286, %c0_208] : memref<40x32xf32, #tpu.memory_space<vmem>>, vector<1x32xf32>
    %c5_209 = arith.constant 5 : index
    %c0_210 = arith.constant 0 : index
    %288 = vector.load %arg18[%c5_209, %c0_210] : memref<8x32xf32, #tpu.memory_space<vmem>>, vector<1x32xf32>
    tpu.vector_store %arg18[%c5_209, %c0_210], %287 {strides = array<i32>} : memref<8x32xf32, #tpu.memory_space<vmem>>, vector<1x32xf32>,
    %c5_211 = arith.constant 5 : index
    %289 = memref.load %arg3[%c5_211] : memref<8xi32, #tpu.memory_space<smem>>
    %290 = arith.index_cast %289 : i32 to index
    %c0_212 = arith.constant 0 : index
    %291 = vector.load %arg16[%290, %c0_212] : memref<16x32xf32, #tpu.memory_space<vmem>>, vector<1x32xf32>
    %c5_213 = arith.constant 5 : index
    %c0_214 = arith.constant 0 : index
    %292 = vector.load %arg19[%c5_213, %c0_214] : memref<8x32xf32, #tpu.memory_space<vmem>>, vector<1x32xf32>
    tpu.vector_store %arg19[%c5_213, %c0_214], %291 {strides = array<i32>} : memref<8x32xf32, #tpu.memory_space<vmem>>, vector<1x32xf32>,
    %293 = arith.index_cast %281 : i32 to index
    %c0_215 = arith.constant 0 : index
    %294 = vector.load %arg8[%293, %c0_215] : memref<24x32xf32, #tpu.memory_space<vmem>>, vector<1x32xf32>
    %c5_216 = arith.constant 5 : index
    %c0_217 = arith.constant 0 : index
    %295 = vector.load %arg20[%c5_216, %c0_217] : memref<8x32xf32, #tpu.memory_space<vmem>>, vector<1x32xf32>
    tpu.vector_store %arg20[%c5_216, %c0_217], %294 {strides = array<i32>} : memref<8x32xf32, #tpu.memory_space<vmem>>, vector<1x32xf32>,
    %c20 = arith.constant 20 : index
    %296 = memref.load %arg2[%c20] : memref<32xi32, #tpu.memory_space<smem>>
    %297 = arith.index_cast %296 : i32 to index
    %c0_218 = arith.constant 0 : index
    %298 = vector.load %arg15[%297, %c0_218] : memref<40x32xf32, #tpu.memory_space<vmem>>, vector<1x32xf32>
    %c20_219 = arith.constant 20 : index
    %c0_220 = arith.constant 0 : index
    %299 = vector.load %arg22[%c20_219, %c0_220] : memref<32x32xf32, #tpu.memory_space<vmem>>, vector<1x32xf32>
    tpu.vector_store %arg22[%c20_219, %c0_220], %298 {strides = array<i32>} : memref<32x32xf32, #tpu.memory_space<vmem>>, vector<1x32xf32>,
    %c21 = arith.constant 21 : index
    %300 = memref.load %arg2[%c21] : memref<32xi32, #tpu.memory_space<smem>>
    %301 = arith.index_cast %300 : i32 to index
    %c0_221 = arith.constant 0 : index
    %302 = vector.load %arg15[%301, %c0_221] : memref<40x32xf32, #tpu.memory_space<vmem>>, vector<1x32xf32>
    %c21_222 = arith.constant 21 : index
    %c0_223 = arith.constant 0 : index
    %303 = vector.load %arg22[%c21_222, %c0_223] : memref<32x32xf32, #tpu.memory_space<vmem>>, vector<1x32xf32>
    tpu.vector_store %arg22[%c21_222, %c0_223], %302 {strides = array<i32>} : memref<32x32xf32, #tpu.memory_space<vmem>>, vector<1x32xf32>,
    %304 = arith.addf %298, %302 : vector<1x32xf32>
    %c22 = arith.constant 22 : index
    %305 = memref.load %arg2[%c22] : memref<32xi32, #tpu.memory_space<smem>>
    %306 = arith.index_cast %305 : i32 to index
    %c0_224 = arith.constant 0 : index
    %307 = vector.load %arg15[%306, %c0_224] : memref<40x32xf32, #tpu.memory_space<vmem>>, vector<1x32xf32>
    %c22_225 = arith.constant 22 : index
    %c0_226 = arith.constant 0 : index
    %308 = vector.load %arg22[%c22_225, %c0_226] : memref<32x32xf32, #tpu.memory_space<vmem>>, vector<1x32xf32>
    tpu.vector_store %arg22[%c22_225, %c0_226], %307 {strides = array<i32>} : memref<32x32xf32, #tpu.memory_space<vmem>>, vector<1x32xf32>,
    %309 = arith.addf %304, %307 : vector<1x32xf32>
    %c23 = arith.constant 23 : index
    %310 = memref.load %arg2[%c23] : memref<32xi32, #tpu.memory_space<smem>>
    %311 = arith.index_cast %310 : i32 to index
    %c0_227 = arith.constant 0 : index
    %312 = vector.load %arg15[%311, %c0_227] : memref<40x32xf32, #tpu.memory_space<vmem>>, vector<1x32xf32>
    %c23_228 = arith.constant 23 : index
    %c0_229 = arith.constant 0 : index
    %313 = vector.load %arg22[%c23_228, %c0_229] : memref<32x32xf32, #tpu.memory_space<vmem>>, vector<1x32xf32>
    tpu.vector_store %arg22[%c23_228, %c0_229], %312 {strides = array<i32>} : memref<32x32xf32, #tpu.memory_space<vmem>>, vector<1x32xf32>,
    %314 = arith.addf %309, %312 : vector<1x32xf32>
    %cst_230 = arith.constant 2.500000e-01 : f32
    %315 = vector.broadcast %cst_230 : f32 to vector<1x32xf32>
    %316 = arith.mulf %314, %315 : vector<1x32xf32>
    %c5_231 = arith.constant 5 : index
    %c0_232 = arith.constant 0 : index
    %317 = vector.load %arg21[%c5_231, %c0_232] : memref<8x32xf32, #tpu.memory_space<vmem>>, vector<1x32xf32>
    tpu.vector_store %arg21[%c5_231, %c0_232], %316 {strides = array<i32>} : memref<8x32xf32, #tpu.memory_space<vmem>>, vector<1x32xf32>,
    %c6_233 = arith.constant 6 : index
    %318 = memref.load %arg0[%c6_233] : memref<8xi32, #tpu.memory_space<smem>>
    %319 = arith.index_cast %318 : i32 to index
    %c0_234 = arith.constant 0 : index
    %320 = vector.load %arg14[%319, %c0_234] : memref<24x32xf32, #tpu.memory_space<vmem>>, vector<1x32xf32>
    %c6_235 = arith.constant 6 : index
    %c0_236 = arith.constant 0 : index
    %321 = vector.load %arg17[%c6_235, %c0_236] : memref<8x32xf32, #tpu.memory_space<vmem>>, vector<1x32xf32>
    tpu.vector_store %arg17[%c6_235, %c0_236], %320 {strides = array<i32>} : memref<8x32xf32, #tpu.memory_space<vmem>>, vector<1x32xf32>,
    %c6_237 = arith.constant 6 : index
    %322 = memref.load %arg1[%c6_237] : memref<8xi32, #tpu.memory_space<smem>>
    %323 = arith.index_cast %322 : i32 to index
    %c0_238 = arith.constant 0 : index
    %324 = vector.load %arg15[%323, %c0_238] : memref<40x32xf32, #tpu.memory_space<vmem>>, vector<1x32xf32>
    %c6_239 = arith.constant 6 : index
    %c0_240 = arith.constant 0 : index
    %325 = vector.load %arg18[%c6_239, %c0_240] : memref<8x32xf32, #tpu.memory_space<vmem>>, vector<1x32xf32>
    tpu.vector_store %arg18[%c6_239, %c0_240], %324 {strides = array<i32>} : memref<8x32xf32, #tpu.memory_space<vmem>>, vector<1x32xf32>,
    %c6_241 = arith.constant 6 : index
    %326 = memref.load %arg3[%c6_241] : memref<8xi32, #tpu.memory_space<smem>>
    %327 = arith.index_cast %326 : i32 to index
    %c0_242 = arith.constant 0 : index
    %328 = vector.load %arg16[%327, %c0_242] : memref<16x32xf32, #tpu.memory_space<vmem>>, vector<1x32xf32>
    %c6_243 = arith.constant 6 : index
    %c0_244 = arith.constant 0 : index
    %329 = vector.load %arg19[%c6_243, %c0_244] : memref<8x32xf32, #tpu.memory_space<vmem>>, vector<1x32xf32>
    tpu.vector_store %arg19[%c6_243, %c0_244], %328 {strides = array<i32>} : memref<8x32xf32, #tpu.memory_space<vmem>>, vector<1x32xf32>,
    %330 = arith.index_cast %318 : i32 to index
    %c0_245 = arith.constant 0 : index
    %331 = vector.load %arg8[%330, %c0_245] : memref<24x32xf32, #tpu.memory_space<vmem>>, vector<1x32xf32>
    %c6_246 = arith.constant 6 : index
    %c0_247 = arith.constant 0 : index
    %332 = vector.load %arg20[%c6_246, %c0_247] : memref<8x32xf32, #tpu.memory_space<vmem>>, vector<1x32xf32>
    tpu.vector_store %arg20[%c6_246, %c0_247], %331 {strides = array<i32>} : memref<8x32xf32, #tpu.memory_space<vmem>>, vector<1x32xf32>,
    %c24 = arith.constant 24 : index
    %333 = memref.load %arg2[%c24] : memref<32xi32, #tpu.memory_space<smem>>
    %334 = arith.index_cast %333 : i32 to index
    %c0_248 = arith.constant 0 : index
    %335 = vector.load %arg15[%334, %c0_248] : memref<40x32xf32, #tpu.memory_space<vmem>>, vector<1x32xf32>
    %c24_249 = arith.constant 24 : index
    %c0_250 = arith.constant 0 : index
    %336 = vector.load %arg22[%c24_249, %c0_250] : memref<32x32xf32, #tpu.memory_space<vmem>>, vector<1x32xf32>
    tpu.vector_store %arg22[%c24_249, %c0_250], %335 {strides = array<i32>} : memref<32x32xf32, #tpu.memory_space<vmem>>, vector<1x32xf32>,
    %c25 = arith.constant 25 : index
    %337 = memref.load %arg2[%c25] : memref<32xi32, #tpu.memory_space<smem>>
    %338 = arith.index_cast %337 : i32 to index
    %c0_251 = arith.constant 0 : index
    %339 = vector.load %arg15[%338, %c0_251] : memref<40x32xf32, #tpu.memory_space<vmem>>, vector<1x32xf32>
    %c25_252 = arith.constant 25 : index
    %c0_253 = arith.constant 0 : index
    %340 = vector.load %arg22[%c25_252, %c0_253] : memref<32x32xf32, #tpu.memory_space<vmem>>, vector<1x32xf32>
    tpu.vector_store %arg22[%c25_252, %c0_253], %339 {strides = array<i32>} : memref<32x32xf32, #tpu.memory_space<vmem>>, vector<1x32xf32>,
    %341 = arith.addf %335, %339 : vector<1x32xf32>
    %c26 = arith.constant 26 : index
    %342 = memref.load %arg2[%c26] : memref<32xi32, #tpu.memory_space<smem>>
    %343 = arith.index_cast %342 : i32 to index
    %c0_254 = arith.constant 0 : index
    %344 = vector.load %arg15[%343, %c0_254] : memref<40x32xf32, #tpu.memory_space<vmem>>, vector<1x32xf32>
    %c26_255 = arith.constant 26 : index
    %c0_256 = arith.constant 0 : index
    %345 = vector.load %arg22[%c26_255, %c0_256] : memref<32x32xf32, #tpu.memory_space<vmem>>, vector<1x32xf32>
    tpu.vector_store %arg22[%c26_255, %c0_256], %344 {strides = array<i32>} : memref<32x32xf32, #tpu.memory_space<vmem>>, vector<1x32xf32>,
    %346 = arith.addf %341, %344 : vector<1x32xf32>
    %c27 = arith.constant 27 : index
    %347 = memref.load %arg2[%c27] : memref<32xi32, #tpu.memory_space<smem>>
    %348 = arith.index_cast %347 : i32 to index
    %c0_257 = arith.constant 0 : index
    %349 = vector.load %arg15[%348, %c0_257] : memref<40x32xf32, #tpu.memory_space<vmem>>, vector<1x32xf32>
    %c27_258 = arith.constant 27 : index
    %c0_259 = arith.constant 0 : index
    %350 = vector.load %arg22[%c27_258, %c0_259] : memref<32x32xf32, #tpu.memory_space<vmem>>, vector<1x32xf32>
    tpu.vector_store %arg22[%c27_258, %c0_259], %349 {strides = array<i32>} : memref<32x32xf32, #tpu.memory_space<vmem>>, vector<1x32xf32>,
    %351 = arith.addf %346, %349 : vector<1x32xf32>
    %cst_260 = arith.constant 2.500000e-01 : f32
    %352 = vector.broadcast %cst_260 : f32 to vector<1x32xf32>
    %353 = arith.mulf %351, %352 : vector<1x32xf32>
    %c6_261 = arith.constant 6 : index
    %c0_262 = arith.constant 0 : index
    %354 = vector.load %arg21[%c6_261, %c0_262] : memref<8x32xf32, #tpu.memory_space<vmem>>, vector<1x32xf32>
    tpu.vector_store %arg21[%c6_261, %c0_262], %353 {strides = array<i32>} : memref<8x32xf32, #tpu.memory_space<vmem>>, vector<1x32xf32>,
    %c7_263 = arith.constant 7 : index
    %355 = memref.load %arg0[%c7_263] : memref<8xi32, #tpu.memory_space<smem>>
    %356 = arith.index_cast %355 : i32 to index
    %c0_264 = arith.constant 0 : index
    %357 = vector.load %arg14[%356, %c0_264] : memref<24x32xf32, #tpu.memory_space<vmem>>, vector<1x32xf32>
    %c7_265 = arith.constant 7 : index
    %c0_266 = arith.constant 0 : index
    %358 = vector.load %arg17[%c7_265, %c0_266] : memref<8x32xf32, #tpu.memory_space<vmem>>, vector<1x32xf32>
    tpu.vector_store %arg17[%c7_265, %c0_266], %357 {strides = array<i32>} : memref<8x32xf32, #tpu.memory_space<vmem>>, vector<1x32xf32>,
    %c7_267 = arith.constant 7 : index
    %359 = memref.load %arg1[%c7_267] : memref<8xi32, #tpu.memory_space<smem>>
    %360 = arith.index_cast %359 : i32 to index
    %c0_268 = arith.constant 0 : index
    %361 = vector.load %arg15[%360, %c0_268] : memref<40x32xf32, #tpu.memory_space<vmem>>, vector<1x32xf32>
    %c7_269 = arith.constant 7 : index
    %c0_270 = arith.constant 0 : index
    %362 = vector.load %arg18[%c7_269, %c0_270] : memref<8x32xf32, #tpu.memory_space<vmem>>, vector<1x32xf32>
    tpu.vector_store %arg18[%c7_269, %c0_270], %361 {strides = array<i32>} : memref<8x32xf32, #tpu.memory_space<vmem>>, vector<1x32xf32>,
    %c7_271 = arith.constant 7 : index
    %363 = memref.load %arg3[%c7_271] : memref<8xi32, #tpu.memory_space<smem>>
    %364 = arith.index_cast %363 : i32 to index
    %c0_272 = arith.constant 0 : index
    %365 = vector.load %arg16[%364, %c0_272] : memref<16x32xf32, #tpu.memory_space<vmem>>, vector<1x32xf32>
    %c7_273 = arith.constant 7 : index
    %c0_274 = arith.constant 0 : index
    %366 = vector.load %arg19[%c7_273, %c0_274] : memref<8x32xf32, #tpu.memory_space<vmem>>, vector<1x32xf32>
    tpu.vector_store %arg19[%c7_273, %c0_274], %365 {strides = array<i32>} : memref<8x32xf32, #tpu.memory_space<vmem>>, vector<1x32xf32>,
    %367 = arith.index_cast %355 : i32 to index
    %c0_275 = arith.constant 0 : index
    %368 = vector.load %arg8[%367, %c0_275] : memref<24x32xf32, #tpu.memory_space<vmem>>, vector<1x32xf32>
    %c7_276 = arith.constant 7 : index
    %c0_277 = arith.constant 0 : index
    %369 = vector.load %arg20[%c7_276, %c0_277] : memref<8x32xf32, #tpu.memory_space<vmem>>, vector<1x32xf32>
    tpu.vector_store %arg20[%c7_276, %c0_277], %368 {strides = array<i32>} : memref<8x32xf32, #tpu.memory_space<vmem>>, vector<1x32xf32>,
    %c28 = arith.constant 28 : index
    %370 = memref.load %arg2[%c28] : memref<32xi32, #tpu.memory_space<smem>>
    %371 = arith.index_cast %370 : i32 to index
    %c0_278 = arith.constant 0 : index
    %372 = vector.load %arg15[%371, %c0_278] : memref<40x32xf32, #tpu.memory_space<vmem>>, vector<1x32xf32>
    %c28_279 = arith.constant 28 : index
    %c0_280 = arith.constant 0 : index
    %373 = vector.load %arg22[%c28_279, %c0_280] : memref<32x32xf32, #tpu.memory_space<vmem>>, vector<1x32xf32>
    tpu.vector_store %arg22[%c28_279, %c0_280], %372 {strides = array<i32>} : memref<32x32xf32, #tpu.memory_space<vmem>>, vector<1x32xf32>,
    %c29 = arith.constant 29 : index
    %374 = memref.load %arg2[%c29] : memref<32xi32, #tpu.memory_space<smem>>
    %375 = arith.index_cast %374 : i32 to index
    %c0_281 = arith.constant 0 : index
    %376 = vector.load %arg15[%375, %c0_281] : memref<40x32xf32, #tpu.memory_space<vmem>>, vector<1x32xf32>
    %c29_282 = arith.constant 29 : index
    %c0_283 = arith.constant 0 : index
    %377 = vector.load %arg22[%c29_282, %c0_283] : memref<32x32xf32, #tpu.memory_space<vmem>>, vector<1x32xf32>
    tpu.vector_store %arg22[%c29_282, %c0_283], %376 {strides = array<i32>} : memref<32x32xf32, #tpu.memory_space<vmem>>, vector<1x32xf32>,
    %378 = arith.addf %372, %376 : vector<1x32xf32>
    %c30 = arith.constant 30 : index
    %379 = memref.load %arg2[%c30] : memref<32xi32, #tpu.memory_space<smem>>
    %380 = arith.index_cast %379 : i32 to index
    %c0_284 = arith.constant 0 : index
    %381 = vector.load %arg15[%380, %c0_284] : memref<40x32xf32, #tpu.memory_space<vmem>>, vector<1x32xf32>
    %c30_285 = arith.constant 30 : index
    %c0_286 = arith.constant 0 : index
    %382 = vector.load %arg22[%c30_285, %c0_286] : memref<32x32xf32, #tpu.memory_space<vmem>>, vector<1x32xf32>
    tpu.vector_store %arg22[%c30_285, %c0_286], %381 {strides = array<i32>} : memref<32x32xf32, #tpu.memory_space<vmem>>, vector<1x32xf32>,
    %383 = arith.addf %378, %381 : vector<1x32xf32>
    %c31 = arith.constant 31 : index
    %384 = memref.load %arg2[%c31] : memref<32xi32, #tpu.memory_space<smem>>
    %385 = arith.index_cast %384 : i32 to index
    %c0_287 = arith.constant 0 : index
    %386 = vector.load %arg15[%385, %c0_287] : memref<40x32xf32, #tpu.memory_space<vmem>>, vector<1x32xf32>
    %c31_288 = arith.constant 31 : index
    %c0_289 = arith.constant 0 : index
    %387 = vector.load %arg22[%c31_288, %c0_289] : memref<32x32xf32, #tpu.memory_space<vmem>>, vector<1x32xf32>
    tpu.vector_store %arg22[%c31_288, %c0_289], %386 {strides = array<i32>} : memref<32x32xf32, #tpu.memory_space<vmem>>, vector<1x32xf32>,
    %388 = arith.addf %383, %386 : vector<1x32xf32>
    %cst_290 = arith.constant 2.500000e-01 : f32
    %389 = vector.broadcast %cst_290 : f32 to vector<1x32xf32>
    %390 = arith.mulf %388, %389 : vector<1x32xf32>
    %c7_291 = arith.constant 7 : index
    %c0_292 = arith.constant 0 : index
    %391 = vector.load %arg21[%c7_291, %c0_292] : memref<8x32xf32, #tpu.memory_space<vmem>>, vector<1x32xf32>
    tpu.vector_store %arg21[%c7_291, %c0_292], %390 {strides = array<i32>} : memref<8x32xf32, #tpu.memory_space<vmem>>, vector<1x32xf32>,
    %c0_293 = arith.constant 0 : index
    %c0_294 = arith.constant 0 : index
    %392 = vector.load %arg17[%c0_293, %c0_294] : memref<8x32xf32, #tpu.memory_space<vmem>>, vector<8x32xf32>
    %c0_295 = arith.constant 0 : index
    %c0_296 = arith.constant 0 : index
    %393 = vector.load %arg18[%c0_295, %c0_296] : memref<8x32xf32, #tpu.memory_space<vmem>>, vector<8x32xf32>
    %c0_297 = arith.constant 0 : index
    %c0_298 = arith.constant 0 : index
    %394 = vector.load %arg19[%c0_297, %c0_298] : memref<8x32xf32, #tpu.memory_space<vmem>>, vector<8x32xf32>
    %c0_299 = arith.constant 0 : index
    %c0_300 = arith.constant 0 : index
    %395 = vector.load %arg20[%c0_299, %c0_300] : memref<8x32xf32, #tpu.memory_space<vmem>>, vector<8x32xf32>
    %c0_301 = arith.constant 0 : index
    %c0_302 = arith.constant 0 : index
    %396 = vector.load %arg21[%c0_301, %c0_302] : memref<8x32xf32, #tpu.memory_space<vmem>>, vector<8x32xf32>
    %c0_303 = arith.constant 0 : index
    %c0_304 = arith.constant 0 : index
    %397 = vector.load %arg22[%c0_303, %c0_304] : memref<32x32xf32, #tpu.memory_space<vmem>>, vector<32x32xf32>
    %398 = arith.mulf %392, %393 : vector<8x32xf32>
    %cst_305 = arith.constant dense<0.000000e+00> : vector<8xf32>
    %399 = vector.multi_reduction <add>, %398, %cst_305 [1] : vector<8x32xf32> to vector<8xf32>
    %400 = vector.shape_cast %399 : vector<8xf32> to vector<8x1xf32>
    %401 = arith.mulf %392, %396 : vector<8x32xf32>
    %cst_306 = arith.constant dense<0.000000e+00> : vector<8xf32>
    %402 = vector.multi_reduction <add>, %401, %cst_306 [1] : vector<8x32xf32> to vector<8xf32>
    %403 = vector.shape_cast %402 : vector<8xf32> to vector<8x1xf32>
    %404 = arith.subf %400, %403 : vector<8x1xf32>
    %cst_307 = arith.constant 0.000000e+00 : f32
    %405 = vector.broadcast %cst_307 : f32 to vector<8x1xf32>
    %406 = arith.minimumf %404, %405 : vector<8x1xf32>
    %407 = math.absf %404 : vector<8x1xf32>
    %cst_308 = arith.constant 0.000000e+00 : f32
    %408 = vector.broadcast %cst_308 : f32 to vector<8x1xf32>
    %409 = arith.subf %408, %407 : vector<8x1xf32>
    %410 = math.exp %409 : vector<8x1xf32>
    %411 = math.log1p %410 : vector<8x1xf32>
    %412 = arith.subf %406, %411 : vector<8x1xf32>
    %413 = vector.shape_cast %412 : vector<8x1xf32> to vector<1x8x1xf32>
    %cst_309 = arith.constant dense<0.000000e+00> : vector<1xf32>
    %414 = vector.multi_reduction <add>, %413, %cst_309 [1, 2] : vector<1x8x1xf32> to vector<1xf32>
    %415 = vector.shape_cast %414 : vector<1xf32> to vector<1x1x1xf32>
    %416 = vector.extract %415[0, 0, 0] : f32 from vector<1x1x1xf32>
    %cst_310 = arith.constant 8.000000e+00 : f32
    %417 = arith.divf %416, %cst_310 : f32
    %cst_311 = arith.constant 0.000000e+00 : f32
    %418 = arith.subf %cst_311, %417 : f32
    %419 = arith.mulf %395, %395 : vector<8x32xf32>
    %420 = vector.shape_cast %419 : vector<8x32xf32> to vector<1x8x32xf32>
    %cst_312 = arith.constant dense<0.000000e+00> : vector<1xf32>
    %421 = vector.multi_reduction <add>, %420, %cst_312 [1, 2] : vector<1x8x32xf32> to vector<1xf32>
    %422 = vector.shape_cast %421 : vector<1xf32> to vector<1x1x1xf32>
    %423 = vector.extract %422[0, 0, 0] : f32 from vector<1x1x1xf32>
    %424 = arith.mulf %393, %393 : vector<8x32xf32>
    %425 = vector.shape_cast %424 : vector<8x32xf32> to vector<1x8x32xf32>
    %cst_313 = arith.constant dense<0.000000e+00> : vector<1xf32>
    %426 = vector.multi_reduction <add>, %425, %cst_313 [1, 2] : vector<1x8x32xf32> to vector<1xf32>
    %427 = vector.shape_cast %426 : vector<1xf32> to vector<1x1x1xf32>
    %428 = vector.extract %427[0, 0, 0] : f32 from vector<1x1x1xf32>
    %429 = arith.addf %423, %428 : f32
    %430 = arith.mulf %397, %397 : vector<32x32xf32>
    %431 = vector.shape_cast %430 : vector<32x32xf32> to vector<1x32x32xf32>
    %cst_314 = arith.constant dense<0.000000e+00> : vector<1xf32>
    %432 = vector.multi_reduction <add>, %431, %cst_314 [1, 2] : vector<1x32x32xf32> to vector<1xf32>
    %433 = vector.shape_cast %432 : vector<1xf32> to vector<1x1x1xf32>
    %434 = vector.extract %433[0, 0, 0] : f32 from vector<1x1x1xf32>
    %435 = arith.addf %429, %434 : f32
    %cst_315 = arith.constant 5.000000e-01 : f32
    %436 = arith.mulf %cst_315, %435 : f32
    %cst_316 = arith.constant 1.250000e-05 : f32
    %437 = arith.mulf %cst_316, %436 : f32
    %438 = arith.addf %392, %393 : vector<8x32xf32>
    %439 = arith.subf %438, %394 : vector<8x32xf32>
    %440 = arith.mulf %439, %439 : vector<8x32xf32>
    %cst_317 = arith.constant dense<0.000000e+00> : vector<8xf32>
    %441 = vector.multi_reduction <add>, %440, %cst_317 [1] : vector<8x32xf32> to vector<8xf32>
    %442 = vector.shape_cast %441 : vector<8xf32> to vector<8x1xf32>
    %443 = math.sqrt %442 : vector<8x1xf32>
    %444 = vector.shape_cast %443 : vector<8x1xf32> to vector<1x8x1xf32>
    %cst_318 = arith.constant dense<0.000000e+00> : vector<1xf32>
    %445 = vector.multi_reduction <add>, %444, %cst_318 [1, 2] : vector<1x8x1xf32> to vector<1xf32>
    %446 = vector.shape_cast %445 : vector<1xf32> to vector<1x1x1xf32>
    %447 = vector.extract %446[0, 0, 0] : f32 from vector<1x1x1xf32>
    %cst_319 = arith.constant 8.000000e+00 : f32
    %448 = arith.divf %447, %cst_319 : f32
    %449 = arith.addf %418, %437 : f32
    %cst_320 = arith.constant 9.99999974E-6 : f32
    %450 = arith.mulf %cst_320, %448 : f32
    %451 = arith.addf %449, %450 : f32
    %c0_321 = arith.constant 0 : index
    %c0_322 = arith.constant 0 : index
    %452 = memref.load %arg11[%c0_321, %c0_322] : memref<1x1xf32, #tpu.memory_space<smem>>
    memref.store %451, %arg11[%c0_321, %c0_322] : memref<1x1xf32, #tpu.memory_space<smem>>
    %c0_323 = arith.constant 0 : index
    %c0_324 = arith.constant 0 : index
    %453 = memref.load %arg12[%c0_323, %c0_324] : memref<1x1xf32, #tpu.memory_space<smem>>
    memref.store %418, %arg12[%c0_323, %c0_324] : memref<1x1xf32, #tpu.memory_space<smem>>
    %c0_325 = arith.constant 0 : index
    %c0_326 = arith.constant 0 : index
    %454 = memref.load %arg13[%c0_325, %c0_326] : memref<1x1xf32, #tpu.memory_space<smem>>
    memref.store %437, %arg13[%c0_325, %c0_326] : memref<1x1xf32, #tpu.memory_space<smem>>
    return
  }
}

</mosaic_0001>

<bundles_post_ra>
// kernel: tpu_custom_call.1
= control target key start
LH: loop header
LB: loop body
LE: loop exit
PB: predicated region body
PF: predicated region fallthrough
CT: control target
= control target key end

     0   :  { %s2242_s0 = inlined_call_operand.vmem [shape: s32[8], index: 0, kind: input, shape index: {}]   ;;  %s2243_s1 = inlined_call_operand.vmem [shape: s32[8], index: 1, kind: input, shape index: {}]   ;;  %s2244_s2 = inlined_call_operand.vmem [shape: s32[32], index: 2, kind: input, shape index: {}]   ;;  %s2245_s3 = inlined_call_operand.vmem [shape: s32[8], index: 3, kind: input, shape index: {}]   ;;  %s2246_s4 = inlined_call_operand.vmem [shape: bf16[24,16], index: 4, kind: input, shape index: {}]   ;;  %s2247_s5 = inlined_call_operand.vmem [shape: bf16[40,16], index: 5, kind: input, shape index: {}]   ;;  %s2248_s6 = inlined_call_operand.vmem [shape: bf16[16,24], index: 6, kind: input, shape index: {}]   ;;  %s2249_s7 = inlined_call_operand.vmem [shape: bf16[16,40], index: 7, kind: input, shape index: {}]   ;;  %s2250_s8 = inlined_call_operand.vmem [shape: f32[24,32], index: 8, kind: input, shape index: {}]   ;;  %s2251_s9 = inlined_call_operand.vmem [shape: f32[40,32], index: 9, kind: input, shape index: {}]   ;;  %s2252_s10 = inlined_call_operand.vmem [shape: f32[16,32], index: 10, kind: input, shape index: {}]   ;;  %s2253_s11 = inlined_call_operand.hbm [shape: f32[1,1], index: 11, kind: output, shape index: {0}]   ;;  %s2254_s12 = inlined_call_operand.hbm [shape: f32[1,1], index: 12, kind: output, shape index: {1}]   ;;  %s2255_s13 = inlined_call_operand.hbm [shape: f32[1,1], index: 13, kind: output, shape index: {2}]  }
   0x1   :  { %2267 = sst [smem:[#allocation50_spill]] %s2250_s8 }
   0x2   :  { %2268 = sst [smem:[#allocation51_spill]] %s2252_s10 }
   0x3   :  { %2269 = sst [smem:[#allocation52_spill]] %s2253_s11 }
   0x4   :  { %2270 = sst [smem:[#allocation53_spill]] %s2254_s12 }
   0x5   :  { %2271 = sst [smem:[#allocation54_spill]] %s2255_s13 }
   0x6   :  { %19 = vsyncpa [#allocation13], 0 }
   0x7   :  { %20 = vsyncpa [#allocation15], 0 }
   0x8   :  { %21 = vsyncpa [#allocation18], 0 }
   0x9   :  { %22 = vsyncpa [#allocation12], 0  ;;  %s40_s27 = sshll.u32 %s2243_s1, 4  ;;  %s41_s27 = int_to_ptr.vmem [resolvable:$true] %s40_s27 }
   0xa   :  { %23 = vsyncpa [#allocation21], 0  ;;  %s30_s30 = sshll.u32 %s2242_s0, 4  ;;  %s1519_s14 = scalar_lea.vmem %s41_s27, 16  ;;  %s31_s30 = int_to_ptr.vmem [resolvable:$true] %s30_s30 }
   0xb   :  { %p1520_p0 = scmp.ne.s32.totalorder %s41_s27, %s1519_s14  ;;  %p1524_p1 = scmp.lt.s32.totalorder %s41_s27, %s41_s27 }
   0xc   :  { %p1525_p2 = scmp.lt.s32.totalorder %s1519_s14, %s1519_s14 }
   0xe   :  { %p1526_p3 = por %p1525_p2, %p1524_p1 }
  0x10   :  { %p1527_p4 = pnand %p1526_p3, %p1520_p0 }
  0x12   :  { %1530 = shalt.err (!%p1527_p4)
}
  0x13   :  { %s1601_s15 = smov [#allocation14]   ;;  %s1531_s16 = scalar_lea.vmem %s31_s30, 16 }
  0x14   :  { %43 = dma.vmem_to_smem %s41_s27, 16, %s1601_s15, [#allocation15]  }
  0x15   :  { %p1532_p5 = scmp.ne.s32.totalorder %s31_s30, %s1531_s16  ;;  %p1536_p6 = scmp.lt.s32.totalorder %s31_s30, %s31_s30 }
  0x16   :  { %p1537_p7 = scmp.lt.s32.totalorder %s1531_s16, %s1531_s16 }
  0x18   :  { %p1538_p8 = por %p1537_p7, %p1536_p6 }
  0x1a   :  { %p1539_p9 = pnand %p1538_p8, %p1532_p5 }
  0x1c   :  { %1542 = shalt.err (!%p1539_p9)
}
  0x1d   :  { %s1602_s1 = smov [#allocation11]   ;;  %s50_s18 = sshll.u32 %s2244_s2, 4  ;;  %s51_s18 = int_to_ptr.vmem [resolvable:$true] %s50_s18 }
  0x1e   :  { %33 = dma.vmem_to_smem %s31_s30, 16, %s1602_s1, [#allocation13]  }
  0x1f   :  { %s60_s21 = sshll.u32 %s2245_s3, 4  ;;  %s1543_s22 = scalar_lea.vmem %s51_s18, 16  ;;  %s61_s21 = int_to_ptr.vmem [resolvable:$true] %s60_s21 }
  0x20   :  { %p1544_p10 = scmp.ne.s32.totalorder %s51_s18, %s1543_s22  ;;  %p1548_p11 = scmp.lt.s32.totalorder %s51_s18, %s51_s18 }
  0x21   :  { %p1549_p12 = scmp.lt.s32.totalorder %s1543_s22, %s1543_s22 }
  0x23   :  { %p1550_p13 = por %p1549_p12, %p1548_p11 }
  0x25   :  { %p1551_p0 = pnand %p1550_p13, %p1544_p10 }
  0x27   :  { %1554 = shalt.err (!%p1551_p0)
}
  0x28   :  { %s1603_s23 = smov [#allocation16]   ;;  %s1555_s24 = scalar_lea.vmem %s61_s21, 16 }
  0x29   :  { %53 = dma.vmem_to_smem %s51_s18, 16, %s1603_s23, [#allocation15]  }
  0x2a   :  { %p1556_p1 = scmp.ne.s32.totalorder %s61_s21, %s1555_s24  ;;  %p1560_p2 = scmp.lt.s32.totalorder %s61_s21, %s61_s21 }
  0x2b   :  { %p1561_p3 = scmp.lt.s32.totalorder %s1555_s24, %s1555_s24 }
  0x2d   :  { %p1562_p4 = por %p1561_p3, %p1560_p2 }
  0x2f   :  { %p1563_p5 = pnand %p1562_p4, %p1556_p1 }
  0x31   :  { %1566 = shalt.err (!%p1563_p5)
}
  0x32   :  { %s1604_s2 = smov [#allocation17]  }
  0x33   :  { %63 = dma.vmem_to_smem %s61_s21, 16, %s1604_s2, [#allocation18]  }
  0x34   :  { %1591 = dma.done.wait [#allocation13], 16  }
  0x35   :  { %1592 = vsyncadd [#allocation13], 4294967280 }
  0x36   :  { %1593 = dma.done.wait [#allocation15], 32  }
  0x37   :  { %1594 = vsyncadd [#allocation15], 4294967264 }
  0x38   :  { %1595 = dma.done.wait [#allocation18], 16  }
  0x39   :  { %1596 = vsyncadd [#allocation18], 4294967280 }
  0x3a   :  { %90 = sfence }
  0x3b   :  { %v92_v0 = vld [vmem:[%s2252_s10] sm:$0xff]  ;;  %v93_v1 = vld [vmem:[%s2252_s10 + $0x8] sm:$0xff]  ;;  %v1605_v2 = vmov 0.0   ;;  %vm1606_vm0 = vmmov 0   ;;  %vm114_vm1 = vcmask 130048   ;;  %vm371_vm2 = vcmask 261120  }
  0x3c   :  { %1375 = vmatprep.subr.bf16.mxu1 %v1605_v2  ;;  %v102_v3 = vpack.c.bf16 %v93_v1, %v92_v0  ;;  %1377 = vmatprep.mubr.msk.bf16.mxu1 %vm1606_vm0, %v1605_v2  ;;  %v1704_v4 = vld [vmem:[%s2247_s5] sm:$0xff]   ;;  %v1712_v6 = vld [vmem:[%s2246_s4 + $0x8] ss:$0 sps:$4 sm:$0xff]   ;;  %v1736_v8 = vld [vmem:[%s2247_s5 + $0x10] ss:$0 sps:$4 sm:$0xff]   ;;  %vm270_vm3 = vcmask 1043456  }
  0x3d   :  { %v1466_v5 = vld [vmem:[%s2246_s4] sm:$0xff]   ;;  %v1727_v7 = vld [vmem:[%s2247_s5 + $0x8] sm:$0xff]   ;;  %vm266_vm4 = vcmask 326656   ;;  %vm320_vm5 = vcmask 195584   ;;  %s1903_s20 = sld [smem:[#allocation14 + $0x1]]  ;;  %vm750_vm6 = vcmask 253952  }
  0x3e   :  { %1376 = vmatpush3.bf16.msra.mxu1 %v102_v3  ;;  %1369 = vmatprep.subr.bf16.mxu0 %v102_v3  ;;  %v1783_v38 = vld [vmem:[%s2249_s7] sm:$0xff]   ;;  %s1905_s21 = sld [smem:[#allocation14 + $0x2]]  ;;  %vm1069_vm8 = vcmask 7168  }
  0x3f   :  { %1370 = vmatpush3.bf16.msra.mxu0 %v102_v3  ;;  %1371 = vmatprep.mubr.msk.bf16.mxu0 %vm114_vm1, %v1466_v5  ;;  %v1797_v41 = vld [vmem:[%s2248_s6] sm:$0xff]   ;;  %s1901_s6 = sld [smem:[#allocation14]] }
  0x40   :  { %1389 = vmatprep.subr.bf16.mxu0 %v1605_v2  ;;  %s1907_s22 = sld [smem:[#allocation14 + $0x3]] }
  0x41   :  { %1378 = vmatmul.mubr.msk.bf16.vlgmr.msra.gmra.mxu1 %vm114_vm1, %v1704_v4  ;;  %s1909_s23 = sld [smem:[#allocation14 + $0x4]] }
  0x42   :  { %1381 = vmatprep.mubr.msk.bf16.mxu1 %vm1606_vm0, %v1605_v2  ;;  %1372 = vmatmul.mubr.msk.bf16.vlgmr.msra.gmra.mxu0 %vm114_vm1, %v1712_v6  ;;  %s1911_s24 = sld [smem:[#allocation14 + $0x5]] }
  0x43   :  { %1395 = vmatprep.mubr.msk.bf16.mxu0 %vm1606_vm0, %v1605_v2  ;;  %s1913_s2 = sld [smem:[#allocation14 + $0x6]] }
  0x44   :  { %s1915_s3 = sld [smem:[#allocation14 + $0x7]] }
  0x45   :  { %s1917_s25 = sld [smem:[#allocation11]] }
  0x46   :  { %s1919_s26 = sld [smem:[#allocation11 + $0x1]] }
  0x47   :  { %s1921_s27 = sld [smem:[#allocation11 + $0x2]] }
  0x48   :  { %s1923_s28 = sld [smem:[#allocation11 + $0x3]] }
  0x49   :  { %1382 = vmatmul.mubr.msk.bf16.gmra.mxu1 %vm114_vm1, %v1727_v7  ;;  %s1925_s29 = sld [smem:[#allocation11 + $0x4]] }
  0x4a   :  { %1385 = vmatprep.mubr.msk.bf16.mxu1 %vm1606_vm0, %v1605_v2  ;;  %s1927_s30 = sld [smem:[#allocation11 + $0x5]] }
  0x4b   :  { %s1929_s14 = sld [smem:[#allocation11 + $0x6]] }
  0x4c   :  { %2272 = sst [smem:[#allocation28_spill]] %s1919_s26 }
  0x4d   :  { %2273 = sst [smem:[#allocation29_spill]] %s1921_s27 }
  0x4e   :  { %2274 = sst [smem:[#allocation30_spill]] %s1923_s28 }
  0x4f   :  { %2275 = sst [smem:[#allocation31_spill]] %s1925_s29 }
  0x50   :  { %2276 = sst [smem:[#allocation32_spill]] %s1927_s30 }
  0x51   :  { %1386 = vmatmul.mubr.msk.bf16.gmra.mxu1 %vm114_vm1, %v1736_v8  ;;  %2277 = sst [smem:[#allocation33_spill]] %s1929_s14 }
  0x52   :  { %1409 = vmatprep.mubr.msk.bf16.mxu1 %vm114_vm1, %v1466_v5  ;;  %s1931_s15 = sld [smem:[#allocation11 + $0x7]] }
  0x53   :  { %s1933_s16 = sld [smem:[#allocation16]] }
  0x54   :  { %s1935_s1 = sld [smem:[#allocation16 + $0x1]] }
  0x55   :  { %s1937_s0 = sld [smem:[#allocation16 + $0x2]] }
  0x56   :  { %s1939_s4 = sld [smem:[#allocation16 + $0x3]] }
  0x57   :  { %s1941_s17 = sld [smem:[#allocation16 + $0x4]] }
  0x58   :  { %2278 = sst [smem:[#allocation34_spill]] %s1931_s15 }
  0x59   :  { %s1944_s5 = sld [smem:[#allocation16 + $0x5]] }
  0x5a   :  { %s1949_s19 = sld [smem:[#allocation16 + $0x6]] }
  0x5b   :  { %s1952_s11 = sld [smem:[#allocation16 + $0x7]] }
  0x5c   :  { %s1954_s13 = sld [smem:[#allocation16 + $0x8]] }
  0x5d   :  { %s1957_s18 = sld [smem:[#allocation16 + $0x9]] }
  0x5e   :  { %s1962_s10 = sld [smem:[#allocation16 + $0xa]] }
  0x5f   :  { %s1965_s15 = sld [smem:[#allocation16 + $0xb]] }
  0x60   :  { %s1967_s14 = sld [smem:[#allocation16 + $0xc]] }
  0x61   :  { %s1971_s12 = sld [smem:[#allocation16 + $0xd]] }
  0x62   :  { %s1976_s29 = sld [smem:[#allocation16 + $0xe]] }
  0x63   :  { %s1979_s28 = sld [smem:[#allocation16 + $0xf]] }
  0x64   :  { %s1981_s27 = sld [smem:[#allocation16 + $0x10]] }
  0x65   :  { %s1985_s30 = sld [smem:[#allocation16 + $0x11]] }
  0x66   :  { %s2028_s26 = sld [smem:[#allocation16 + $0x1c]] }
  0x67   :  { %2279 = sst [smem:[#allocation35_spill]] %s1971_s12 }
  0x68   :  { %2280 = sst [smem:[#allocation36_spill]] %s1976_s29 }
  0x69   :  { %2281 = sst [smem:[#allocation37_spill]] %s1979_s28 }
  0x6a   :  { %2282 = sst [smem:[#allocation38_spill]] %s1981_s27 }
  0x6b   :  { %2283 = sst [smem:[#allocation39_spill]] %s1985_s30 }
  0x6c   :  { %s1990_s12 = sld [smem:[#allocation16 + $0x12]] }
  0x6d   :  { %s1993_s27 = sld [smem:[#allocation16 + $0x13]] }
  0x6e   :  { %s1995_s28 = sld [smem:[#allocation16 + $0x14]] }
  0x6f   :  { %s1998_s30 = sld [smem:[#allocation16 + $0x15]] }
  0x70   :  { %s2001_s29 = sld [smem:[#allocation16 + $0x16]] }
  0x71   :  { %2291 = sst [smem:[#allocation47_spill]] %s2028_s26  ;;  %s825_s26 = scalar_lea.vmem [#allocation3], %s1905_s21 }
  0x72   :  { %2284 = sst [smem:[#allocation40_spill]] %s1990_s12  ;;  %s764_s21 = scalar_lea.vmem [#allocation3], %s1933_s16 }
  0x73   :  { %2285 = sst [smem:[#allocation41_spill]] %s1993_s27  ;;  %s809_s16 = scalar_lea.vmem [#allocation3], %s1949_s19 }
  0x74   :  { %2286 = sst [smem:[#allocation42_spill]] %s1995_s28  ;;  %s850_s19 = scalar_lea.vmem [#allocation3], %s1965_s15 }
  0x75   :  { %2287 = sst [smem:[#allocation43_spill]] %s1998_s30 }
  0x76   :  { %2288 = sst [smem:[#allocation44_spill]] %s2001_s29  ;;  %s753_s29 = scalar_lea.vmem [#allocation3], %s1901_s6 }
  0x77   :  { %s2006_s27 = sld [smem:[#allocation16 + $0x17]]  ;;  %s933_s6 = scalar_lea.vmem [#allocation3], %s1911_s24 }
  0x78   :  { %s2009_s28 = sld [smem:[#allocation16 + $0x18]]  ;;  %s778_s24 = scalar_lea.vmem [#allocation3], %s1939_s4 }
  0x79   :  { %s2013_s30 = sld [smem:[#allocation16 + $0x19]]  ;;  %s840_s4 = scalar_lea.vmem [#allocation3], %s1957_s18 }
  0x7a   :  { %s2037_s12 = sld [smem:[#allocation16 + $0x1d]] }
  0x7b   :  { %s2042_s7 = sld [smem:[#allocation16 + $0x1f]] }
  0x7c   :  { %s2296_s18 = sld [smem:[#allocation30_spill]] }
  0x7e   :  { %2289 = sst [smem:[#allocation45_spill]] %s2009_s28 }
  0x7f   :  { %s2025_s28 = sld [smem:[#allocation16 + $0x1b]] }
  0x81   :  { %2293 = sst [smem:[#allocation49_spill]] %s2042_s7  ;;  %s897_s7 = scalar_lea.vmem [#allocation3], %s1909_s23 }
  0x82   :  { %s773_s23 = scalar_lea.vmem [#allocation3], %s1937_s0  ;;  %s836_s0 = scalar_lea.vmem [#allocation3], %s1954_s13 }
  0x83   :  { %s872_s13 = scalar_lea.vmem [#allocation3], %s1967_s14  ;;  %s2300_s14 = sld [smem:[#allocation34_spill]] }
  0x84   :  { %s857_s15 = scalar_lea.vmem [#allocation2], %s2296_s18 }
 0x101   :  { %v1741_v9 = vpop.f32.mrf.mxu1 }
 0x102   :  { %v390_v10 = vmul.f32 %v1741_v9, %v1741_v9  ;;  %v1745_v11 = vpop.f32.mrf.mxu0 }
 0x103   :  { %v1379_v12 = vpop.f32.mrf.mxu1  ;;  %v255_v36 = vpack.c.bf16 %v1745_v11, %v1745_v11 }
 0x104   :  { %v395_v13 = vsel %vm371_vm2, %v390_v10, 0.0  ;;  %v1748_v14 = vpop.f32.mrf.mxu0 }
 0x105   :  { %396 = vadd.xlane.f32.xlu1 %v395_v13  ;;  %v1750_v15 = vpop.f32.mrf.mxu1  ;;  %v325_v39 = vsel %vm270_vm3, %v255_v36, 0  ;;  %v368_v60 = vmul.f32 %v1748_v14, %v1748_v14  ;;  %v370_v36 = vmul.f32 %v1745_v11, %v1745_v11 }
 0x106   :  { %v391_v16 = vmul.f32 %v1750_v15, %v1750_v15  ;;  %v1374_v17 = vpop.f32.mrf.mxu0  ;;  %v258_v37 = vpack.c.bf16 %v1750_v15, %v1741_v9 }
 0x107   :  { %v1380_v18 = vpop.f32.mrf.mxu1  ;;  %v372_v61 = vsel %vm371_vm2, %v368_v60, 0.0 }
 0x108   :  { %v398_v19 = vsel %vm371_vm2, %v391_v16, 0.0  ;;  %v1757_v22 = vpop.f32.mrf.mxu0 }
 0x109   :  { %399 = vadd.xlane.f32.xlu1 %v398_v19  ;;  %v1755_v20 = vpop.f32.mrf.mxu1  ;;  %v369_v25 = vmul.f32 %v1757_v22, %v1757_v22  ;;  %v254_v40 = vpack.c.bf16 %v1757_v22, %v1748_v14 }
 0x10a   :  { %v392_v56 = vmul.f32 %v1755_v20, %v1755_v20 }
 0x10b   :  { %v1383_v21 = vpop.f32.mrf.mxu1  ;;  %v375_v30 = vsel %vm371_vm2, %v369_v25, 0.0 }
 0x10c   :  { %v401_v57 = vsel %vm371_vm2, %v392_v56, 0.0 }
 0x10d   :  { %v1759_v23 = vpop.f32.mrf.mxu1 }
 0x10e   :  { %v393_v24 = vmul.f32 %v1759_v23, %v1759_v23  ;;  %v259_v34 = vpack.c.bf16 %v1759_v23, %v1755_v20 }
 0x10f   :  { %v1384_v26 = vpop.f32.mrf.mxu1 }
 0x110   :  { %v404_v27 = vsel %vm371_vm2, %v393_v24, 0.0 }
 0x111   :  { %405 = vadd.xlane.f32.xlu1 %v404_v27  ;;  %v1766_v28 = vpop.f32.mrf.mxu1 }
 0x112   :  { %v260_v29 = vpack.c.bf16 %v1766_v28, %v1766_v28  ;;  %v394_v58 = vmul.f32 %v1766_v28, %v1766_v28 }
 0x113   :  { %v1387_v31 = vpop.f32.mrf.mxu1 }
 0x114   :  { %v272_v32 = vsel %vm270_vm3, %v260_v29, 0  ;;  %v407_v59 = vsel %vm371_vm2, %v394_v58, 0.0 }
 0x115   :  { %v249_v33 = vpop.f32.mrf.mxu1  ;;  %1390 = vmatpush3.bf16.msra.mxu0 %v272_v32  ;;  %376 = vadd.xlane.f32.xlu1 %v375_v30 }
 0x116   :  { %1391 = vmatprep.subr.bf16.mxu0 %v1605_v2 }
 0x117   :  { %v1388_v35 = vpop.f32.mrf.mxu1 }
 0x119   :  { %1392 = vmatpush3.bf16.msra.mxu0 %v259_v34 }
 0x11a   :  { %1393 = vmatprep.subr.bf16.mxu0 %v1605_v2 }
 0x11d   :  { %1394 = vmatpush3.bf16.msra.mxu0 %v258_v37 }
 0x11e   :  { %1399 = vmatprep.subr.bf16.mxu0 %v1605_v2 }
 0x120   :  { %1396 = vmatmul.mubr.msk.bf16.vlgmr.msra.gmra.mxu0 %vm266_vm4, %v1783_v38 }
 0x121   :  { %1400 = vmatpush3.bf16.msra.mxu0 %v325_v39  ;;  %1403 = vmatprep.mubr.msk.bf16.mxu0 %vm1606_vm0, %v1605_v2 }
 0x122   :  { %1401 = vmatprep.subr.bf16.mxu0 %v1605_v2 }
 0x125   :  { %1402 = vmatpush3.bf16.msra.mxu0 %v254_v40 }
 0x126   :  { %1413 = vmatprep.subr.bf16.mxu0 %v1605_v2 }
 0x128   :  { %1404 = vmatmul.mubr.msk.bf16.vlgmr.msra.gmra.mxu0 %vm320_vm5, %v1797_v41 }
 0x129   :  { %1415 = vmatprep.mubr.msk.bf16.mxu0 %vm1606_vm0, %v1605_v2 }
 0x1e0   :  { %v308_v42 = vpop.f32.mrf.mxu0 }
 0x1e2   :  { %v1397_v43 = vpop.f32.mrf.mxu0 }
 0x1e4   :  { %v311_v44 = vpop.f32.mrf.mxu0 }
 0x1e6   :  { %v1398_v45 = vpop.f32.mrf.mxu0 }
 0x1e7   :  { %v378_v45 = vsel %vm371_vm2, %v370_v36, 0.0  ;;  %v97_v36 = vld [vmem:[%s2251_s9] sm:$0xff] }
 0x1e8   :  { %v361_v46 = vpop.f32.mrf.mxu0 }
 0x1e9   :  { %v362_v47 = vadd.f32 %v361_v46, %v308_v42 }
 0x1ea   :  { %v1405_v48 = vpop.f32.mrf.mxu0 }
 0x1eb   :  { %v425_v49 = vmul.f32 %v362_v47, %v362_v47 }
 0x1ec   :  { %v364_v50 = vpop.f32.mrf.mxu0 }
 0x1ed   :  { %v365_v51 = vadd.f32 %v364_v50, %v311_v44  ;;  %v427_v52 = vsel %vm371_vm2, %v425_v49, 0.0 }
 0x1ee   :  { %428 = vadd.xlane.f32.xlu0 %v427_v52  ;;  %v1406_v53 = vpop.f32.mrf.mxu0 }
 0x1ef   :  { %v426_v54 = vmul.f32 %v365_v51, %v365_v51 }
 0x1f1   :  { %v430_v55 = vsel %vm371_vm2, %v426_v54, 0.0 }
 0x1f2   :  { %431 = vadd.xlane.f32.xlu0 %v430_v55 }
 0x1f6   :  { %402 = vadd.xlane.f32.xlu0 %v401_v57 }
 0x1fa   :  { %408 = vadd.xlane.f32.xlu0 %v407_v59  ;;  %v397_v59 = vpop.xlane.xlu1 %396 }
 0x1fe   :  { %373 = vadd.xlane.f32.xlu0 %v372_v61  ;;  %v400_v60 = vpop.xlane.xlu1 %399 }
 0x277   :  { %v429_v62 = vpop.xlane.xlu0 %428 }
 0x278   :  { %v433_v63 = vmax.f32 %v429_v62, 1e-24  ;;  %v406_v62 = vpop.xlane.xlu1 %405 }
 0x27a   :  { %1471 = vrsqrt.f32 %v433_v63 }
 0x27b   :  { %v432_v0 = vpop.xlane.xlu0 %431 }
 0x27c   :  { %v434_v1 = vmax.f32 %v432_v0, 1e-24  ;;  %v377_v0 = vpop.xlane.xlu1 %376 }
 0x27e   :  { %1473 = vrsqrt.f32 %v434_v1 }
 0x27f   :  { %v403_v61 = vpop.xlane.xlu0 %402 }
 0x283   :  { %v409_v63 = vpop.xlane.xlu0 %408 }
 0x287   :  { %v1472_v3 = vpop.eup %1471 }
 0x288   :  { %v1815_v10 = vmul.f32 %v1472_v3, %v362_v47 }
 0x28b   :  { %v1474_v5 = vpop.eup %1473 }
 0x28c   :  { %v1817_v12 = vmul.f32 %v1474_v5, %v365_v51  ;;  %v412_v5 = vmax.f32 %v403_v61, 1e-24 }
 0x28e   :  { %v449_v13 = vpack.c.bf16 %v1817_v12, %v1815_v10 }
 0x290   :  { %1407 = vmatprep.subr.bf16.mxu1 %v449_v13  ;;  %1414 = vmatpush3.bf16.msra.mxu0 %v449_v13 }
 0x291   :  { %1408 = vmatpush3.bf16.msra.mxu1 %v449_v13 }
 0x292   :  { %1427 = vmatprep.subr.bf16.mxu1 %v1605_v2 }
 0x293   :  { %1416 = vmatmul.mubr.msk.bf16.vlgmr.msra.gmra.mxu0 %vm114_vm1, %v1704_v4 }
 0x294   :  { %1419 = vmatprep.mubr.msk.bf16.mxu0 %vm1606_vm0, %v1605_v2  ;;  %1410 = vmatmul.mubr.msk.bf16.vlgmr.msra.gmra.mxu1 %vm114_vm1, %v1712_v6 }
 0x295   :  { %1433 = vmatprep.mubr.msk.bf16.mxu1 %vm1606_vm0, %v1605_v2 }
 0x29b   :  { %1420 = vmatmul.mubr.msk.bf16.gmra.mxu0 %vm114_vm1, %v1727_v7 }
 0x29c   :  { %1423 = vmatprep.mubr.msk.bf16.mxu0 %vm1606_vm0, %v1605_v2 }
 0x2a3   :  { %1424 = vmatmul.mubr.msk.bf16.gmra.mxu0 %vm114_vm1, %v1736_v8 }
 0x353   :  { %v1836_v16 = vpop.f32.mrf.mxu0 }
 0x354   :  { %v668_v4 = vmul.f32 %v1836_v16, %v1836_v16  ;;  %v1840_v17 = vpop.f32.mrf.mxu1 }
 0x355   :  { %v1417_v6 = vpop.f32.mrf.mxu0  ;;  %v649_v51 = vmul.f32 %v1840_v17, %v1840_v17  ;;  %v555_v55 = vpack.c.bf16 %v1840_v17, %v1840_v17 }
 0x356   :  { %v673_v18 = vsel %vm371_vm2, %v668_v4, 0.0  ;;  %v1843_v19 = vpop.f32.mrf.mxu1  ;;  %v413_v6 = vmax.f32 %v406_v62, 1e-24 }
 0x357   :  { %674 = vadd.xlane.f32.xlu1 %v673_v18  ;;  %v1845_v7 = vpop.f32.mrf.mxu0  ;;  %v647_v43 = vmul.f32 %v1843_v19, %v1843_v19  ;;  %v656_v54 = vsel %vm371_vm2, %v649_v51, 0.0  ;;  %v604_v57 = vsel %vm270_vm3, %v555_v55, 0 }
 0x358   :  { %v669_v21 = vmul.f32 %v1845_v7, %v1845_v7  ;;  %v1412_v24 = vpop.f32.mrf.mxu1  ;;  %v556_v56 = vpack.c.bf16 %v1845_v7, %v1836_v16 }
 0x359   :  { %v1418_v8 = vpop.f32.mrf.mxu0  ;;  %v650_v50 = vsel %vm371_vm2, %v647_v43, 0.0 }
 0x35a   :  { %v676_v25 = vsel %vm371_vm2, %v669_v21, 0.0  ;;  %v1859_v34 = vpop.f32.mrf.mxu1  ;;  %v414_v8 = vmax.f32 %v409_v63, 1e-24 }
 0x35b   :  { %677 = vadd.xlane.f32.xlu0 %v676_v25  ;;  %v1850_v26 = vpop.f32.mrf.mxu0  ;;  %v648_v42 = vmul.f32 %v1859_v34, %v1859_v34  ;;  %v554_v58 = vpack.c.bf16 %v1859_v34, %v1843_v19 }
 0x35c   :  { %v670_v27 = vmul.f32 %v1850_v26, %v1850_v26 }
 0x35d   :  { %v1421_v29 = vpop.f32.mrf.mxu0  ;;  %v653_v49 = vsel %vm371_vm2, %v648_v42, 0.0 }
 0x35e   :  { %v679_v30 = vsel %vm371_vm2, %v670_v27, 0.0  ;;  %v382_v29 = vmax.f32 %v377_v0, 1e-24 }
 0x35f   :  { %680 = vadd.xlane.f32.xlu1 %v679_v30  ;;  %v1855_v31 = vpop.f32.mrf.mxu0 }
 0x360   :  { %v671_v32 = vmul.f32 %v1855_v31, %v1855_v31  ;;  %v557_v53 = vpack.c.bf16 %v1855_v31, %v1850_v26 }
 0x361   :  { %v1422_v33 = vpop.f32.mrf.mxu0 }
 0x362   :  { %v682_v35 = vsel %vm371_vm2, %v671_v32, 0.0 }
 0x363   :  { %683 = vadd.xlane.f32.xlu0 %v682_v35  ;;  %v1864_v37 = vpop.f32.mrf.mxu0 }
 0x364   :  { %v558_v39 = vpack.c.bf16 %v1864_v37, %v1864_v37  ;;  %v672_v40 = vmul.f32 %v1864_v37, %v1864_v37 }
 0x365   :  { %v1425_v44 = vpop.f32.mrf.mxu0 }
 0x366   :  { %v685_v46 = vsel %vm371_vm2, %v672_v40, 0.0  ;;  %v560_v47 = vsel %vm270_vm3, %v558_v39, 0 }
 0x367   :  { %379 = vadd.xlane.f32.xlu0 %v378_v45  ;;  %686 = vadd.xlane.f32.xlu1 %v685_v46  ;;  %v551_v48 = vpop.f32.mrf.mxu0 }
 0x368   :  { %1428 = vmatpush3.bf16.msra.mxu1 %v560_v47 }
 0x369   :  { %v1426_v52 = vpop.f32.mrf.mxu0  ;;  %1429 = vmatprep.subr.bf16.mxu1 %v1605_v2 }
 0x36b   :  { %654 = vadd.xlane.f32.xlu0 %v653_v49  ;;  %651 = vadd.xlane.f32.xlu1 %v650_v50 }
 0x36c   :  { %1430 = vmatpush3.bf16.msra.mxu1 %v557_v53 }
 0x36d   :  { %1431 = vmatprep.subr.bf16.mxu1 %v1605_v2 }
 0x36f   :  { %657 = vadd.xlane.f32.xlu1 %v656_v54 }
 0x370   :  { %1432 = vmatpush3.bf16.msra.mxu1 %v556_v56 }
 0x371   :  { %1437 = vmatprep.subr.bf16.mxu1 %v1605_v2 }
 0x373   :  { %1434 = vmatmul.mubr.msk.bf16.vlgmr.msra.gmra.mxu1 %vm266_vm4, %v1783_v38  ;;  %v410_v38 = vmax.f32 %v397_v59, 1e-24 }
 0x374   :  { %1438 = vmatpush3.bf16.msra.mxu1 %v604_v57  ;;  %1441 = vmatprep.mubr.msk.bf16.mxu1 %vm1606_vm0, %v1605_v2 }
 0x375   :  { %1439 = vmatprep.subr.bf16.mxu1 %v1605_v2  ;;  %v411_v2 = vmax.f32 %v400_v60, 1e-24  ;;  %1475 = vrsqrt.f32 %v410_v38 }
 0x377   :  { %1477 = vrsqrt.f32 %v411_v2  ;;  %v100_v2 = vld [vmem:[%s2251_s9 + $0x18] sm:$0xff] }
 0x378   :  { %1440 = vmatpush3.bf16.msra.mxu1 %v554_v58 }
 0x37b   :  { %1442 = vmatmul.mubr.msk.bf16.vlgmr.msra.gmra.mxu1 %vm320_vm5, %v1797_v41  ;;  %v374_v41 = vpop.xlane.xlu0 %373 }
 0x37c   :  { %v381_v33 = vmax.f32 %v374_v41, 1e-24 }
 0x382   :  { %v1476_v24 = vpop.eup %1475 }
 0x383   :  { %v420_v32 = vmul.f32 %v1476_v24, %v1741_v9 }
 0x384   :  { %v1478_v30 = vpop.eup %1477 }
 0x385   :  { %v442_v45 = vadd.f32 %v420_v32, %v97_v36  ;;  %v421_v46 = vmul.f32 %v1478_v30, %v1750_v15 }
 0x3e0   :  { %v675_v1 = vpop.xlane.xlu1 %674 }
 0x3e1   :  { %v688_v3 = vmax.f32 %v675_v1, 1e-24 }
 0x3e3   :  { %1479 = vrsqrt.f32 %v688_v3 }
 0x3e4   :  { %v678_v13 = vpop.xlane.xlu0 %677  ;;  %1481 = vrsqrt.f32 %v412_v5 }
 0x3e5   :  { %v689_v4 = vmax.f32 %v678_v13, 1e-24 }
 0x3e7   :  { %1483 = vrsqrt.f32 %v689_v4 }
 0x3e8   :  { %v681_v18 = vpop.xlane.xlu1 %680  ;;  %1485 = vrsqrt.f32 %v413_v6 }
 0x3e9   :  { %v690_v21 = vmax.f32 %v681_v18, 1e-24 }
 0x3eb   :  { %1487 = vrsqrt.f32 %v690_v21 }
 0x3ec   :  { %v684_v25 = vpop.xlane.xlu0 %683 }
 0x3ed   :  { %v691_v27 = vmax.f32 %v684_v25, 1e-24  ;;  %v95_v25 = vld [vmem:[%s2250_s8 + $0x8] sm:$0xff] }
 0x3ef   :  { %1489 = vrsqrt.f32 %v691_v27 }
 0x3f0   :  { %v1480_v35 = vpop.eup %1479  ;;  %1491 = vrsqrt.f32 %v414_v8  ;;  %v380_v39 = vpop.xlane.xlu0 %379 }
 0x3f1   :  { %v687_v40 = vpop.xlane.xlu1 %686  ;;  %v698_v42 = vmul.f32 %v1480_v35, %v1836_v16  ;;  %1493 = vrsqrt.f32 %v382_v29  ;;  %v383_v9 = vmax.f32 %v380_v39, 1e-24  ;;  %v1482_v44 = vpop.eup %1481  ;;  %v98_v16 = vld [vmem:[%s2251_s9 + $0x8] sm:$0xff] }
 0x3f2   :  { %v692_v43 = vmax.f32 %v687_v40, 1e-24  ;;  %1495 = vrsqrt.f32 %v381_v33  ;;  %v443_v55 = vadd.f32 %v421_v46, %v98_v16  ;;  %v422_v56 = vmul.f32 %v1482_v44, %v1755_v20 }
 0x3f3   :  { %v723_v47 = vmul.f32 0.5, %v698_v42 }
 0x3f4   :  { %v1484_v48 = vpop.eup %1483  ;;  %1497 = vrsqrt.f32 %v692_v43  ;;  %v655_v49 = vpop.xlane.xlu0 %654  ;;  %v96_v43 = vld [vmem:[%s2250_s8 + $0x10] sm:$0xff] }
 0x3f5   :  { %v652_v50 = vpop.xlane.xlu1 %651  ;;  %v728_v51 = vadd.f32 %v723_v47, %v442_v45  ;;  %v699_v52 = vmul.f32 %v1484_v48, %v1845_v7  ;;  %v660_v53 = vmax.f32 %v655_v49, 1e-24  ;;  %1499 = vrsqrt.f32 %v383_v9  ;;  %v1486_v15 = vpop.eup %1485  ;;  %v99_v7 = vld [vmem:[%s2251_s9 + $0x10] sm:$0xff] }
 0x3f6   :  { %v659_v54 = vmax.f32 %v652_v50, 1e-24  ;;  %v423_v20 = vmul.f32 %v1486_v15, %v1759_v23  ;;  %v444_v63 = vadd.f32 %v422_v56, %v99_v7 }
 0x3f7   :  { %740 = vst.msk [vmem:[#allocation3] sm:$0xff] %vm371_vm2, %v728_v51  ;;  %v724_v57 = vmul.f32 0.5, %v699_v52  ;;  %1501 = vrsqrt.f32 %v660_v53 }
 0x3f8   :  { %v1488_v58 = vpop.eup %1487  ;;  %1503 = vrsqrt.f32 %v659_v54  ;;  %v445_v3 = vadd.f32 %v423_v20, %v100_v2 }
 0x3f9   :  { %v658_v59 = vpop.xlane.xlu1 %657  ;;  %v729_v60 = vadd.f32 %v724_v57, %v443_v55  ;;  %v700_v61 = vmul.f32 %v1488_v58, %v1850_v26 }
 0x3fa   :  { %v661_v62 = vmax.f32 %v658_v59, 1e-24 }
 0x3fb   :  { %741 = vst.msk [vmem:[#allocation3 + $0x8] sm:$0xff] %vm371_vm2, %v729_v60  ;;  %v725_v38 = vmul.f32 0.5, %v700_v61 }
 0x3fc   :  { %1505 = vrsqrt.f32 %v661_v62  ;;  %v1490_v0 = vpop.eup %1489 }
 0x3fd   :  { %v1492_v26 = vpop.eup %1491  ;;  %v730_v41 = vadd.f32 %v725_v38, %v444_v63  ;;  %v701_v1 = vmul.f32 %v1490_v0, %v1855_v31  ;;  %v101_v31 = vld [vmem:[%s2251_s9 + $0x20] sm:$0xff]  ;;  %s2019_s9 = sld [smem:[#allocation16 + $0x1a]] }
 0x3fe   :  { %v1494_v23 = vpop.eup %1493  ;;  %v424_v4 = vmul.f32 %v1492_v26, %v1766_v28 }
 0x3ff   :  { %742 = vst.msk [vmem:[#allocation3 + $0x10] sm:$0xff] %vm371_vm2, %v730_v41  ;;  %v726_v5 = vmul.f32 0.5, %v701_v1  ;;  %v1496_v13 = vpop.eup %1495  ;;  %v388_v8 = vmul.f32 %v1494_v23, %v1757_v22  ;;  %v94_v22 = vld [vmem:[%s2250_s8] sm:$0xff]  ;;  %s789_s8 = scalar_lea.vmem [#allocation3], %s1903_s20  ;;  %s1005_s20 = scalar_lea.vmem [#allocation3], %s1915_s3 }
 0x400   :  { %v446_v27 = vadd.f32 %v424_v4, %v101_v31  ;;  %v387_v29 = vmul.f32 %v1496_v13, %v1748_v14  ;;  %s804_s3 = scalar_lea.vmem [#allocation3], %s1944_s5  ;;  %s2295_s5 = sld [smem:[#allocation29_spill]] }
 0x401   :  { %v1498_v6 = vpop.eup %1497  ;;  %v731_v18 = vadd.f32 %v726_v5, %v445_v3  ;;  %v440_v36 = vadd.f32 %v388_v8, %v95_v25 }
 0x402   :  { %v702_v21 = vmul.f32 %v1498_v6, %v1864_v37  ;;  %v1500_v24 = vpop.eup %1499  ;;  %v439_v42 = vadd.f32 %v387_v29, %v94_v22 }
 0x403   :  { %743 = vst.msk [vmem:[#allocation3 + $0x18] sm:$0xff] %vm371_vm2, %v731_v18  ;;  %2290 = sst [smem:[#allocation46_spill]] %s2019_s9  ;;  %v389_v14 = vmul.f32 %v1500_v24, %v1745_v11 }
 0x404   :  { %v1502_v28 = vpop.eup %1501  ;;  %v727_v30 = vmul.f32 0.5, %v702_v21  ;;  %s2040_s9 = sld [smem:[#allocation16 + $0x1e]] }
 0x405   :  { %v1504_v37 = vpop.eup %1503  ;;  %v666_v32 = vmul.f32 %v1502_v28, %v1859_v34  ;;  %v441_v45 = vadd.f32 %v389_v14, %v96_v43 }
 0x406   :  { %v732_v33 = vadd.f32 %v727_v30, %v446_v27  ;;  %v665_v35 = vmul.f32 %v1504_v37, %v1843_v19 }
 0x407   :  { %v718_v39 = vmul.f32 0.5, %v666_v32 }
 0x408   :  { %744 = vst.msk [vmem:[#allocation3 + $0x20] sm:$0xff] %vm371_vm2, %v732_v33  ;;  %v717_v34 = vmul.f32 0.5, %v665_v35 }
 0x409   :  { %v1506_v40 = vpop.eup %1505  ;;  %v721_v9 = vadd.f32 %v718_v39, %v440_v36 }
 0x40a   :  { %v667_v19 = vmul.f32 %v1506_v40, %v1840_v17  ;;  %v720_v44 = vadd.f32 %v717_v34, %v439_v42  ;;  %2292 = sst [smem:[#allocation48_spill]] %s2040_s9  ;;  %s861_s9 = scalar_lea.vmem [#allocation3], %s1907_s22 }
 0x40b   :  { %738 = vst.msk [vmem:[#allocation2 + $0x8] sm:$0xff] %vm371_vm2, %v721_v9  ;;  %s768_s22 = scalar_lea.vmem [#allocation3], %s1935_s1  ;;  %s814_s1 = scalar_lea.vmem [#allocation3], %s1952_s11 }
 0x40c   :  { %v719_v11 = vmul.f32 0.5, %v667_v19  ;;  %737 = vst.msk [vmem:[#allocation2] sm:$0xff] %vm371_vm2, %v720_v44  ;;  %s845_s11 = scalar_lea.vmem [#allocation3], %s1962_s10  ;;  %s2299_s10 = sld [smem:[#allocation33_spill]] }
 0x40e   :  { %v722_v46 = vadd.f32 %v719_v11, %v441_v45 }
 0x40f   :  { %v754_v17 = vld [vmem:[%s753_s29] sm:$0x1] }
 0x410   :  { %739 = vst.msk [vmem:[#allocation2 + $0x10] sm:$0xff] %vm371_vm2, %v722_v46  ;;  %v790_v47 = vld [vmem:[%s789_s8] sm:$0x1]  ;;  %s969_s8 = scalar_lea.vmem [#allocation3], %s1913_s2  ;;  %s800_s2 = scalar_lea.vmem [#allocation3], %s1941_s17 }
 0x411   :  { %v826_v48 = vld [vmem:[%s825_s26] sm:$0x1]  ;;  %755 = vst.msk [vmem:[#allocation6] sm:$0x1] %vm750_vm6, %v754_v17  ;;  %791 = vst.msk [vmem:[#allocation6 + $0x1] sm:$0x1] %vm750_vm6, %v790_v47 }
 0x412   :  { %827 = vst.msk [vmem:[#allocation6 + $0x2] sm:$0x1] %vm750_vm6, %v826_v48  ;;  %v862_v16 = vld [vmem:[%s861_s9] sm:$0x1]  ;;  %s2294_s17 = sld [smem:[#allocation28_spill]]  ;;  %s748_s9 = scalar_lea.vmem [#allocation2], %s1917_s25 }
 0x413   :  { %v898_v49 = vld [vmem:[%s897_s7] sm:$0x1]  ;;  %863 = vst.msk [vmem:[#allocation6 + $0x3] sm:$0x1] %vm750_vm6, %v862_v16  ;;  %s2297_s26 = sld [smem:[#allocation31_spill]] }
 0x414   :  { %v934_v50 = vld [vmem:[%s933_s6] sm:$0x1]  ;;  %899 = vst.msk [vmem:[#allocation6 + $0x4] sm:$0x1] %vm750_vm6, %v898_v49  ;;  %s2298_s7 = sld [smem:[#allocation32_spill]]  ;;  %s821_s6 = scalar_lea.vmem [#allocation2], %s2295_s5 }
 0x415   :  { %935 = vst.msk [vmem:[#allocation6 + $0x5] sm:$0x1] %vm750_vm6, %v934_v50  ;;  %v970_v51 = vld [vmem:[%s969_s8] sm:$0x1]  ;;  %s2301_s8 = sld [smem:[#allocation35_spill]] }
 0x416   :  { %v1006_v52 = vld [vmem:[%s1005_s20] sm:$0x1]  ;;  %971 = vst.msk [vmem:[#allocation6 + $0x6] sm:$0x1] %vm750_vm6, %v970_v51 }
 0x417   :  { %v765_v53 = vld [vmem:[%s764_s21] sm:$0x1]  ;;  %1007 = vst.msk [vmem:[#allocation6 + $0x7] sm:$0x1] %vm750_vm6, %v1006_v52 }
 0x418   :  { %v769_v54 = vld [vmem:[%s768_s22] sm:$0x1]  ;;  %766 = vst.msk [vmem:[#allocation10] sm:$0x1] %vm750_vm6, %v765_v53  ;;  %s785_s29 = scalar_lea.vmem [#allocation2], %s2294_s17  ;;  %s2302_s22 = sld [smem:[#allocation36_spill]] }
 0x419   :  { %v774_v15 = vld [vmem:[%s773_s23] sm:$0x1]  ;;  %v771_v56 = vadd.f32 %v769_v54, %v765_v53  ;;  %770 = vst.msk [vmem:[#allocation10 + $0x1] sm:$0x1] %vm750_vm6, %v769_v54  ;;  %s893_s20 = scalar_lea.vmem [#allocation2], %s2297_s26  ;;  %s2303_s23 = sld [smem:[#allocation37_spill]] }
 0x41a   :  { %v779_v55 = vld [vmem:[%s778_s24] sm:$0x1]  ;;  %775 = vst.msk [vmem:[#allocation10 + $0x2] sm:$0x1] %vm750_vm6, %v774_v15  ;;  %s929_s21 = scalar_lea.vmem [#allocation2], %s2298_s7  ;;  %s965_s24 = scalar_lea.vmem [#allocation2], %s2299_s10 }
 0x41b   :  { %780 = vst.msk [vmem:[#allocation10 + $0x3] sm:$0x1] %vm750_vm6, %v779_v55  ;;  %v801_v57 = vld [vmem:[%s800_s2] sm:$0x1]  ;;  %v776_v20 = vadd.f32 %v774_v15, %v771_v56  ;;  %s1001_s2 = scalar_lea.vmem [#allocation2], %s2300_s14 }
 0x41c   :  { %v805_v58 = vld [vmem:[%s804_s3] sm:$0x1]  ;;  %802 = vst.msk [vmem:[#allocation10 + $0x4] sm:$0x1] %vm750_vm6, %v801_v57  ;;  %s2304_s3 = sld [smem:[#allocation38_spill]] }
 0x41d   :  { %v810_v7 = vld [vmem:[%s809_s16] sm:$0x1]  ;;  %v807_v59 = vadd.f32 %v805_v58, %v801_v57  ;;  %806 = vst.msk [vmem:[#allocation10 + $0x5] sm:$0x1] %vm750_vm6, %v805_v58  ;;  %v781_v4 = vadd.f32 %v779_v55, %v776_v20  ;;  %s876_s16 = scalar_lea.vmem [#allocation3], %s2301_s8 }
 0x41e   :  { %v815_v60 = vld [vmem:[%s814_s1] sm:$0x1]  ;;  %811 = vst.msk [vmem:[#allocation10 + $0x6] sm:$0x1] %vm750_vm6, %v810_v7  ;;  %s2305_s1 = sld [smem:[#allocation39_spill]]  ;;  %v2140_v53 = vld [vmem:[#allocation6] sm:$0xff] }
 0x41f   :  { %v837_v61 = vld [vmem:[%s836_s0] sm:$0x1]  ;;  %816 = vst.msk [vmem:[#allocation10 + $0x7] sm:$0x1] %vm750_vm6, %v815_v60  ;;  %v812_v23 = vadd.f32 %v810_v7, %v807_v59  ;;  %v782_v8 = vmul.f32 0.25, %v781_v4  ;;  %s881_s0 = scalar_lea.vmem [#allocation3], %s2302_s22 }
 0x420   :  { %v841_v62 = vld [vmem:[%s840_s4] sm:$0x1]  ;;  %838 = vst.msk [vmem:[#allocation10 + $0x8] sm:$0x1] %vm750_vm6, %v837_v61  ;;  %s2306_s4 = sld [smem:[#allocation40_spill]] }
 0x421   :  { %v843_v63 = vadd.f32 %v841_v62, %v837_v61  ;;  %v846_v38 = vld [vmem:[%s845_s11] sm:$0x1]  ;;  %842 = vst.msk [vmem:[#allocation10 + $0x9] sm:$0x1] %vm750_vm6, %v841_v62  ;;  %v817_v21 = vadd.f32 %v815_v60, %v812_v23  ;;  %s886_s11 = scalar_lea.vmem [#allocation3], %s2303_s23 }
 0x422   :  { %v851_v0 = vld [vmem:[%s850_s19] sm:$0x1]  ;;  %847 = vst.msk [vmem:[#allocation10 + $0xa] sm:$0x1] %vm750_vm6, %v846_v38  ;;  %s2307_s19 = sld [smem:[#allocation41_spill]] }
 0x423   :  { %v873_v2 = vld [vmem:[%s872_s13] sm:$0x1]  ;;  %852 = vst.msk [vmem:[#allocation10 + $0xb] sm:$0x1] %vm750_vm6, %v851_v0  ;;  %v848_v6 = vadd.f32 %v846_v38, %v843_v63  ;;  %v818_v30 = vmul.f32 0.25, %v817_v21  ;;  %s908_s13 = scalar_lea.vmem [#allocation3], %s2304_s3 }
 0x424   :  { %v749_v26 = vld [vmem:[%s748_s9] sm:$0x1]  ;;  %874 = vst.msk [vmem:[#allocation10 + $0xc] sm:$0x1] %vm750_vm6, %v873_v2  ;;  %s2308_s9 = sld [smem:[#allocation42_spill]] }
 0x425   :  { %v786_v41 = vld [vmem:[%s785_s29] sm:$0x1]  ;;  %751 = vst.msk [vmem:[#allocation5] sm:$0x1] %vm750_vm6, %v749_v26  ;;  %v853_v28 = vadd.f32 %v851_v0, %v848_v6  ;;  %s912_s29 = scalar_lea.vmem [#allocation3], %s2305_s1  ;;  %s2313_s3 = sld [smem:[#allocation47_spill]] }
 0x426   :  { %v822_v1 = vld [vmem:[%s821_s6] sm:$0x1]  ;;  %787 = vst.msk [vmem:[#allocation5 + $0x1] sm:$0x1] %vm750_vm6, %v786_v41  ;;  %s2309_s6 = sld [smem:[#allocation43_spill]]  ;;  %s917_s8 = scalar_lea.vmem [#allocation3], %s2306_s4 }
 0x427   :  { %823 = vst.msk [vmem:[#allocation5 + $0x2] sm:$0x1] %vm750_vm6, %v822_v1  ;;  %v858_v3 = vld [vmem:[%s857_s15] sm:$0x1]  ;;  %s2310_s15 = sld [smem:[#allocation44_spill]]  ;;  %v854_v32 = vmul.f32 0.25, %v853_v28 }
 0x428   :  { %v894_v5 = vld [vmem:[%s893_s20] sm:$0x1]  ;;  %859 = vst.msk [vmem:[#allocation5 + $0x3] sm:$0x1] %vm750_vm6, %v858_v3  ;;  %783 = vst.msk [vmem:[#allocation9] sm:$0x1] %vm750_vm6, %v782_v8 }
 0x429   :  { %v930_v13 = vld [vmem:[%s929_s21] sm:$0x1]  ;;  %895 = vst.msk [vmem:[#allocation5 + $0x4] sm:$0x1] %vm750_vm6, %v894_v5  ;;  %s922_s20 = scalar_lea.vmem [#allocation3], %s2307_s19  ;;  %s2311_s21 = sld [smem:[#allocation45_spill]] }
 0x42a   :  { %931 = vst.msk [vmem:[#allocation5 + $0x5] sm:$0x1] %vm750_vm6, %v930_v13  ;;  %v966_v31 = vld [vmem:[%s965_s24] sm:$0x1]  ;;  %819 = vst.msk [vmem:[#allocation9 + $0x1] sm:$0x1] %vm750_vm6, %v818_v30 }
 0x42b   :  { %v1002_v18 = vld [vmem:[%s1001_s2] sm:$0x1]  ;;  %967 = vst.msk [vmem:[#allocation5 + $0x6] sm:$0x1] %vm750_vm6, %v966_v31  ;;  %s944_s22 = scalar_lea.vmem [#allocation3], %s2308_s9  ;;  %s2312_s2 = sld [smem:[#allocation46_spill]] }
 0x42c   :  { %v877_v24 = vld [vmem:[%s876_s16] sm:$0x1]  ;;  %1003 = vst.msk [vmem:[#allocation5 + $0x7] sm:$0x1] %vm750_vm6, %v1002_v18  ;;  %s948_s23 = scalar_lea.vmem [#allocation3], %s2309_s6  ;;  %s958_s16 = scalar_lea.vmem [#allocation3], %s2006_s27 }
 0x42d   :  { %v879_v25 = vadd.f32 %v877_v24, %v873_v2  ;;  %v882_v27 = vld [vmem:[%s881_s0] sm:$0x1]  ;;  %878 = vst.msk [vmem:[#allocation10 + $0xd] sm:$0x1] %vm750_vm6, %v877_v24  ;;  %s953_s24 = scalar_lea.vmem [#allocation3], %s2310_s15  ;;  %s984_s0 = scalar_lea.vmem [#allocation3], %s2013_s30 }
 0x42e   :  { %v887_v29 = vld [vmem:[%s886_s11] sm:$0x1]  ;;  %883 = vst.msk [vmem:[#allocation10 + $0xe] sm:$0x1] %vm750_vm6, %v882_v27  ;;  %855 = vst.msk [vmem:[#allocation9 + $0x2] sm:$0x1] %vm750_vm6, %v854_v32 }
 0x42f   :  { %888 = vst.msk [vmem:[#allocation10 + $0xf] sm:$0x1] %vm750_vm6, %v887_v29  ;;  %v909_v37 = vld [vmem:[%s908_s13] sm:$0x1]  ;;  %v884_v33 = vadd.f32 %v882_v27, %v879_v25  ;;  %s980_s1 = scalar_lea.vmem [#allocation3], %s2311_s21  ;;  %s2314_s4 = sld [smem:[#allocation48_spill]] }
 0x430   :  { %v913_v22 = vld [vmem:[%s912_s29] sm:$0x1]  ;;  %910 = vst.msk [vmem:[#allocation10 + $0x10] sm:$0x1] %vm750_vm6, %v909_v37  ;;  %s994_s19 = scalar_lea.vmem [#allocation3], %s2025_s28  ;;  %s1016_s13 = scalar_lea.vmem [#allocation3], %s2313_s3 }
 0x431   :  { %v915_v35 = vadd.f32 %v913_v22, %v909_v37  ;;  %v918_v36 = vld [vmem:[%s917_s8] sm:$0x1]  ;;  %914 = vst.msk [vmem:[#allocation10 + $0x11] sm:$0x1] %vm750_vm6, %v913_v22  ;;  %v889_v43 = vadd.f32 %v887_v29, %v884_v33  ;;  %s989_s11 = scalar_lea.vmem [#allocation3], %s2312_s2  ;;  %s2315_s27 = sld [smem:[#allocation49_spill]] }
 0x432   :  { %v923_v14 = vld [vmem:[%s922_s20] sm:$0x1]  ;;  %919 = vst.msk [vmem:[#allocation10 + $0x12] sm:$0x1] %vm750_vm6, %v918_v36  ;;  %s1020_s30 = scalar_lea.vmem [#allocation3], %s2037_s12  ;;  %s2316_s6 = sld [smem:[#allocation50_spill]] }
 0x433   :  { %v945_v39 = vld [vmem:[%s944_s22] sm:$0x1]  ;;  %924 = vst.msk [vmem:[#allocation10 + $0x13] sm:$0x1] %vm750_vm6, %v923_v14  ;;  %v920_v34 = vadd.f32 %v918_v36, %v915_v35  ;;  %v890_v48 = vmul.f32 0.25, %v889_v43  ;;  %v1036_v52 = vld [vmem:[#allocation5] sm:$0xff]  ;;  %v596_v63 = vpop.f32.mrf.mxu1 }
 0x434   :  { %v949_v40 = vld [vmem:[%s948_s23] sm:$0x1]  ;;  %946 = vst.msk [vmem:[#allocation10 + $0x14] sm:$0x1] %vm750_vm6, %v945_v39  ;;  %v2148_v58 = vadd.f32 %v2140_v53, %v1036_v52  ;;  %v1045_v4 = vmul.f32 %v2140_v53, %v1036_v52  ;;  %s1308_s12 = sld [smem:[#allocation17 + $0x3]] }
 0x435   :  { %v954_v42 = vld [vmem:[%s953_s24] sm:$0x1]  ;;  %v951_v9 = vadd.f32 %v949_v40, %v945_v39  ;;  %950 = vst.msk [vmem:[#allocation10 + $0x15] sm:$0x1] %vm750_vm6, %v949_v40  ;;  %v925_v16 = vadd.f32 %v923_v14, %v920_v34  ;;  %s1025_s9 = scalar_lea.vmem [#allocation3], %s2314_s4  ;;  %v1435_v38 = vpop.f32.mrf.mxu1  ;;  %s1315_s29 = sld [smem:[#allocation17 + $0x4]] }
 0x436   :  { %v959_v19 = vld [vmem:[%s958_s16] sm:$0x1]  ;;  %955 = vst.msk [vmem:[#allocation10 + $0x16] sm:$0x1] %vm750_vm6, %v954_v42  ;;  %891 = vst.msk [vmem:[#allocation9 + $0x3] sm:$0x1] %vm750_vm6, %v890_v48 }
 0x437   :  { %v981_v44 = vld [vmem:[%s980_s1] sm:$0x1]  ;;  %960 = vst.msk [vmem:[#allocation10 + $0x17] sm:$0x1] %vm750_vm6, %v959_v19  ;;  %v956_v49 = vadd.f32 %v954_v42, %v951_v9  ;;  %s1030_s28 = scalar_lea.vmem [#allocation3], %s2315_s27  ;;  %v926_v56 = vmul.f32 0.25, %v925_v16  ;;  %v599_v0 = vpop.f32.mrf.mxu1 }
 0x438   :  { %v985_v45 = vld [vmem:[%s984_s0] sm:$0x1]  ;;  %982 = vst.msk [vmem:[#allocation10 + $0x18] sm:$0x1] %vm750_vm6, %v981_v44  ;;  %v1046_v21 = vsel %vm371_vm2, %v1045_v4, 0.0  ;;  %s760_s15 = scalar_lea.vmem %s2316_s6, %s1917_s25  ;;  %s796_s21 = scalar_lea.vmem %s2316_s6, %s2294_s17 }
 0x439   :  { %v987_v11 = vadd.f32 %v985_v45, %v981_v44  ;;  %v990_v46 = vld [vmem:[%s989_s11] sm:$0x1]  ;;  %986 = vst.msk [vmem:[#allocation10 + $0x19] sm:$0x1] %vm750_vm6, %v985_v45  ;;  %v961_v57 = vadd.f32 %v959_v19, %v956_v49  ;;  %927 = vst.msk [vmem:[#allocation9 + $0x4] sm:$0x1] %vm750_vm6, %v926_v56  ;;  %v1436_v2 = vpop.f32.mrf.mxu1  ;;  %s832_s24 = scalar_lea.vmem %s2316_s6, %s2295_s5  ;;  %s868_s16 = scalar_lea.vmem %s2316_s6, %s2296_s18 }
 0x43a   :  { %v995_v17 = vld [vmem:[%s994_s19] sm:$0x1]  ;;  %991 = vst.msk [vmem:[#allocation10 + $0x1a] sm:$0x1] %vm750_vm6, %v990_v46  ;;  %s904_s17 = scalar_lea.vmem %s2316_s6, %s2297_s26  ;;  %s940_s11 = scalar_lea.vmem %s2316_s6, %s2298_s7 }
 0x43b   :  { %v1017_v47 = vld [vmem:[%s1016_s13] sm:$0x1]  ;;  %996 = vst.msk [vmem:[#allocation10 + $0x1b] sm:$0x1] %vm750_vm6, %v995_v17  ;;  %v992_v54 = vadd.f32 %v990_v46, %v987_v11  ;;  %v962_v60 = vmul.f32 0.25, %v961_v57  ;;  %v640_v26 = vpop.f32.mrf.mxu1  ;;  %s976_s19 = scalar_lea.vmem %s2316_s6, %s2299_s10  ;;  %s756_s26 = sld [smem:[#allocation17]] }
 0x43c   :  { %v1021_v50 = vld [vmem:[%s1020_s30] sm:$0x1]  ;;  %1018 = vst.msk [vmem:[#allocation10 + $0x1c] sm:$0x1] %vm750_vm6, %v1017_v47  ;;  %v641_v41 = vadd.f32 %v640_v26, %v596_v63  ;;  %s1012_s30 = scalar_lea.vmem %s2316_s6, %s2300_s14  ;;  %s2317_s14 = sld [smem:[#allocation51_spill]] }
 0x43d   :  { %v1026_v51 = vld [vmem:[%s1025_s9] sm:$0x1]  ;;  %v1023_v15 = vadd.f32 %v1021_v50, %v1017_v47  ;;  %1022 = vst.msk [vmem:[#allocation10 + $0x1d] sm:$0x1] %vm750_vm6, %v1021_v50  ;;  %v997_v7 = vadd.f32 %v995_v17, %v992_v54  ;;  %963 = vst.msk [vmem:[#allocation9 + $0x5] sm:$0x1] %vm750_vm6, %v962_v60  ;;  %v1443_v1 = vpop.f32.mrf.mxu1 }
 0x43e   :  { %v1031_v55 = vld [vmem:[%s1030_s28] sm:$0x1]  ;;  %1027 = vst.msk [vmem:[#allocation10 + $0x1e] sm:$0x1] %vm750_vm6, %v1026_v51  ;;  %v703_v23 = vmul.f32 %v641_v41, %v641_v41  ;;  %s1294_s9 = sld [smem:[#allocation17 + $0x1]]  ;;  %s865_s2 = scalar_lea.vmem [#allocation4], %s1308_s12 }
 0x43f   :  { %1032 = vst.msk [vmem:[#allocation10 + $0x1f] sm:$0x1] %vm750_vm6, %v1031_v55  ;;  %v1028_v59 = vadd.f32 %v1026_v51, %v1023_v15  ;;  %v998_v61 = vmul.f32 0.25, %v997_v7  ;;  %v643_v3 = vpop.f32.mrf.mxu1  ;;  %v761_v25 = vld [vmem:[%s760_s15] sm:$0x1]  ;;  %s1301_s28 = sld [smem:[#allocation17 + $0x2]] }
 0x440   :  { %v644_v5 = vadd.f32 %v643_v3, %v599_v0  ;;  %v705_v13 = vsel %vm371_vm2, %v703_v23, 0.0  ;;  %v797_v27 = vld [vmem:[%s796_s21] sm:$0x1]  ;;  %762 = vst.msk [vmem:[#allocation8] sm:$0x1] %vm750_vm6, %v761_v25  ;;  %s1322_s8 = sld [smem:[#allocation17 + $0x5]] }
 0x441   :  { %v1033_v62 = vadd.f32 %v1031_v55, %v1028_v59  ;;  %999 = vst.msk [vmem:[#allocation9 + $0x6] sm:$0x1] %vm750_vm6, %v998_v61  ;;  %706 = vadd.xlane.f32.xlu0 %v705_v13  ;;  %v1444_v6 = vpop.f32.mrf.mxu1  ;;  %798 = vst.msk [vmem:[#allocation8 + $0x1] sm:$0x1] %vm750_vm6, %v797_v27  ;;  %v833_v29 = vld [vmem:[%s832_s24] sm:$0x1] }
 0x442   :  { %v704_v18 = vmul.f32 %v644_v5, %v644_v5  ;;  %v869_v30 = vld [vmem:[%s868_s16] sm:$0x1]  ;;  %834 = vst.msk [vmem:[#allocation8 + $0x2] sm:$0x1] %vm750_vm6, %v833_v29  ;;  %v1518_v49 = vld [vmem:[%s2317_s14 + $0x8] sm:$0xff]  ;;  %s1329_s20 = sld [smem:[#allocation17 + $0x6]] }
 0x443   :  { %v1034_v20 = vmul.f32 0.25, %v1033_v62  ;;  %870 = vst.msk [vmem:[#allocation8 + $0x3] sm:$0x1] %vm750_vm6, %v869_v30  ;;  %v905_v37 = vld [vmem:[%s904_s17] sm:$0x1]  ;;  %v448_v50 = vadd.f32 %v1518_v49, %v1817_v12  ;;  %s1336_s21 = sld [smem:[#allocation17 + $0x7]] }
 0x444   :  { %v708_v24 = vsel %vm371_vm2, %v704_v18, 0.0  ;;  %v941_v22 = vld [vmem:[%s940_s11] sm:$0x1]  ;;  %906 = vst.msk [vmem:[#allocation8 + $0x4] sm:$0x1] %vm750_vm6, %v905_v37  ;;  %s757_s22 = scalar_lea.vmem [#allocation4], %s756_s26 }
 0x445   :  { %1035 = vst.msk [vmem:[#allocation9 + $0x7] sm:$0x1] %vm750_vm6, %v1034_v20  ;;  %1047 = vadd.xlane.f32.xlu0 %v1046_v21  ;;  %709 = vadd.xlane.f32.xlu1 %v708_v24  ;;  %942 = vst.msk [vmem:[#allocation8 + $0x5] sm:$0x1] %vm750_vm6, %v941_v22  ;;  %v977_v32 = vld [vmem:[%s976_s19] sm:$0x1] }
 0x446   :  { %v1013_v33 = vld [vmem:[%s1012_s30] sm:$0x1]  ;;  %978 = vst.msk [vmem:[#allocation8 + $0x6] sm:$0x1] %vm750_vm6, %v977_v32  ;;  %s793_s23 = scalar_lea.vmem [#allocation4], %s1294_s9  ;;  %s829_s24 = scalar_lea.vmem [#allocation4], %s1301_s28 }
 0x447   :  { %1014 = vst.msk [vmem:[#allocation8 + $0x7] sm:$0x1] %vm750_vm6, %v1013_v33  ;;  %v1517_v11 = vld [vmem:[%s2317_s14] sm:$0xff]  ;;  %s901_s3 = scalar_lea.vmem [#allocation4], %s1315_s29  ;;  %s937_s16 = scalar_lea.vmem [#allocation4], %s1322_s8  ;;  %v1041_v61 = vld [vmem:[#allocation10] sm:$0xff]  ;;  %v1095_v33 = vmul.f32 %v2140_v53, %v2140_v53 }
 0x448   :  { %v447_v46 = vadd.f32 %v1517_v11, %v1815_v10  ;;  %s973_s25 = scalar_lea.vmem [#allocation4], %s1329_s20  ;;  %v1042_v62 = vld [vmem:[#allocation10 + $0x8] sm:$0xff]  ;;  %v1107_v63 = vmul.f32 %v1041_v61, %v1041_v61  ;;  %v1043_v2 = vld [vmem:[#allocation10 + $0x10] sm:$0xff]  ;;  %s1607_s7 = smov [#allocation20]  }
 0x449   :  { %s1009_s1 = scalar_lea.vmem [#allocation4], %s1336_s21  ;;  %v1108_v38 = vmul.f32 %v1042_v62, %v1042_v62  ;;  %v1109_v4 = vmul.f32 %v1043_v2, %v1043_v2  ;;  %s2318_s9 = sld [smem:[#allocation53_spill]] }
 0x44a   :  { %v1111_v3 = vsel %vm371_vm2, %v1107_v63, 0.0  ;;  %s1608_s28 = smov [#allocation22]   ;;  %s2319_s6 = sld [smem:[#allocation54_spill]] }
 0x44b   :  { %v1114_v37 = vsel %vm371_vm2, %v1109_v4, 0.0 }
 0x44c   :  { %v1040_v31 = vld [vmem:[#allocation9] sm:$0xff] }
 0x44d   :  { %v1049_v8 = vmul.f32 %v1040_v31, %v1036_v52 }
 0x44f   :  { %v1050_v28 = vsel %vm371_vm2, %v1049_v8, 0.0  ;;  %v1044_v8 = vld [vmem:[#allocation10 + $0x18] sm:$0xff] }
 0x450   :  { %1051 = vadd.xlane.f32.xlu1 %v1050_v28  ;;  %v1110_v30 = vmul.f32 %v1044_v8, %v1044_v8 }
 0x4ca   :  { %v707_v35 = vpop.xlane.xlu0 %706 }
 0x4cb   :  { %v711_v36 = vmax.f32 %v707_v35, 1e-24  ;;  %v1116_v35 = vsel %vm371_vm2, %v1110_v30, 0.0 }
 0x4cd   :  { %1507 = vrsqrt.f32 %v711_v36 }
 0x4ce   :  { %v710_v14 = vpop.xlane.xlu1 %709  ;;  %v1048_v40 = vpop.xlane.xlu0 %1047 }
 0x4cf   :  { %v712_v39 = vmax.f32 %v710_v14, 1e-24  ;;  %v1096_v14 = vsel %vm371_vm2, %v1095_v33, 0.0 }
 0x4d1   :  { %1509 = vrsqrt.f32 %v712_v39 }
 0x4d9   :  { %v1052_v42 = vpop.xlane.xlu1 %1051 }
 0x4da   :  { %v2199_v43 = vsub.f32 %v1048_v40, %v1052_v42  ;;  %v1508_v44 = vpop.eup %1507 }
 0x4db   :  { %v715_v45 = vmul.f32 %v1508_v44, %v641_v41  ;;  %v1039_v41 = vld [vmem:[#allocation8] sm:$0xff] }
 0x4dc   :  { %v1055_v34 = vand.u32 2147483647, %v2199_v43  ;;  %v1084_v31 = vmul.f32 %v1039_v41, %v1039_v41  ;;  %v1054_v24 = vmin.f32 %v2199_v43, 0.0 }
 0x4dd   :  { %v733_v17 = vmul.f32 0.5, %v715_v45 }
 0x4de   :  { %v1056_v9 = vsub.f32 0.0, %v1055_v34  ;;  %v1510_v47 = vpop.eup %1509  ;;  %v1085_v29 = vsel %vm371_vm2, %v1084_v31, 0.0 }
 0x4df   :  { %v735_v48 = vadd.f32 %v733_v17, %v447_v46  ;;  %v716_v16 = vmul.f32 %v1510_v47, %v644_v5  ;;  %v1112_v5 = vsel %vm371_vm2, %v1108_v38, 0.0 }
 0x4e0   :  { %v1057_v19 = vmul.f32 1.442695, %v1056_v9  ;;  %v1113_v28 = vadd.f32 %v1112_v5, %v1111_v3 }
 0x4e1   :  { %745 = vst.msk [vmem:[#allocation4] sm:$0xff] %vm371_vm2, %v735_v48  ;;  %v734_v51 = vmul.f32 0.5, %v716_v16 }
 0x4e2   :  { %1511 = vpow2.f32 %v1057_v19  ;;  %v1115_v32 = vadd.f32 %v1114_v37, %v1113_v28 }
 0x4e3   :  { %v736_v10 = vadd.f32 %v734_v51, %v448_v50 }
 0x4e4   :  { %v1117_v36 = vadd.f32 %v1116_v35, %v1115_v32 }
 0x4e5   :  { %746 = vst.msk [vmem:[#allocation4 + $0x8] sm:$0xff] %vm371_vm2, %v736_v10 }
 0x4ec   :  { %v758_v15 = vld [vmem:[%s757_s22] sm:$0x1]  ;;  %s1609_s22 = smov [#allocation19]  }
 0x4ed   :  { %v794_v55 = vld [vmem:[%s793_s23] sm:$0x1]  ;;  %759 = vst.msk [vmem:[#allocation7] sm:$0x1] %vm750_vm6, %v758_v15 }
 0x4ee   :  { %v830_v56 = vld [vmem:[%s829_s24] sm:$0x1]  ;;  %795 = vst.msk [vmem:[#allocation7 + $0x1] sm:$0x1] %vm750_vm6, %v794_v55 }
 0x4ef   :  { %v1512_v52 = vpop.eup %1511  ;;  %831 = vst.msk [vmem:[#allocation7 + $0x2] sm:$0x1] %vm750_vm6, %v830_v56  ;;  %v866_v12 = vld [vmem:[%s865_s2] sm:$0x1]  ;;  %s2320_s2 = sld [smem:[#allocation52_spill]] }
 0x4f0   :  { %v1059_v54 = vadd.f32 1.0, %v1512_v52  ;;  %v902_v57 = vld [vmem:[%s901_s3] sm:$0x1]  ;;  %867 = vst.msk [vmem:[#allocation7 + $0x3] sm:$0x1] %vm750_vm6, %v866_v12  ;;  %v1062_v20 = vmul.f32 -0.5, %v1512_v52 }
 0x4f1   :  { %v938_v7 = vld [vmem:[%s937_s16] sm:$0x1]  ;;  %903 = vst.msk [vmem:[#allocation7 + $0x4] sm:$0x1] %vm750_vm6, %v902_v57  ;;  %v1065_v1 = vand.u32 2147483647, %v1512_v52 }
 0x4f2   :  { %1513 = vlog2.f32 %v1059_v54  ;;  %939 = vst.msk [vmem:[#allocation7 + $0x5] sm:$0x1] %vm750_vm6, %v938_v7  ;;  %v974_v59 = vld [vmem:[%s973_s25] sm:$0x1]  ;;  %v1063_v0 = vadd.f32 1.0, %v1062_v20 }
 0x4f3   :  { %v1010_v60 = vld [vmem:[%s1009_s1] sm:$0x1]  ;;  %975 = vst.msk [vmem:[#allocation7 + $0x6] sm:$0x1] %vm750_vm6, %v974_v59  ;;  %vm1066_vm7 = vcmp.lt.f32.partialorder %v1065_v1, 0.0004427343 }
 0x4f4   :  { %1011 = vst.msk [vmem:[#allocation7 + $0x7] sm:$0x1] %vm750_vm6, %v1010_v60  ;;  %v1064_v21 = vmul.f32 %v1512_v52, %v1063_v0 }
 0x4fb   :  { %v1038_v26 = vld [vmem:[#allocation7] sm:$0xff] }
 0x4fc   :  { %v1131_v23 = vsub.f32 %v2148_v58, %v1038_v26 }
 0x4fe   :  { %v1132_v6 = vmul.f32 %v1131_v23, %v1131_v23 }
 0x4ff   :  { %v1514_v13 = vpop.eup %1513 }
 0x500   :  { %v1061_v18 = vmul.f32 0.6931472, %v1514_v13  ;;  %v1133_v25 = vsel %vm371_vm2, %v1132_v6, 0.0 }
 0x501   :  { %1134 = vadd.xlane.f32.xlu0 %v1133_v25 }
 0x502   :  { %v1067_v27 = vsel %vm1066_vm7, %v1064_v21, %v1061_v18 }
 0x503   :  { %v1068_v58 = vsub.f32 %v1054_v24, %v1067_v27 }
 0x505   :  { %v1070_v22 = vsel %vm1069_vm8, %v1068_v58, 0.0  ;;  %1086 = vadd.xlane.f32.xlu0 %v1085_v29 }
 0x506   :  { %1071 = vadd.xlane.f32.xlu1 %v1070_v22 }
 0x509   :  { %1118 = vadd.xlane.f32.xlu0 %v1117_v36 }
 0x50a   :  { %1097 = vadd.xlane.f32.xlu1 %v1096_v14 }
 0x58a   :  { %v1135_v39 = vpop.xlane.xlu0 %1134 }
 0x58b   :  { %1515 = vrsqrt.f32 %v1135_v39  ;;  %vm1138_vm9 = vcmp.eq.f32.partialorder %v1135_v39, inf  ;;  %v1141_v7 = vand.u32 2147483648, %v1135_v39  ;;  %vm1140_vm10 = vcmp.eq.f32.partialorder %v1135_v39, 0.0 }
 0x58e   :  { %v1087_v42 = vpop.xlane.xlu0 %1086 }
 0x58f   :  { %v1072_v40 = vpop.xlane.xlu1 %1071  ;;  %v1088_v34 = vrot.slane %v1087_v42, 4 }
 0x590   :  { %v1073_v43 = vrot.slane %v1072_v40, 4 }
 0x591   :  { %v1089_v19 = vadd.f32 %v1088_v34, %v1087_v42 }
 0x592   :  { %v1074_v9 = vadd.f32 %v1073_v43, %v1072_v40  ;;  %v1119_v53 = vpop.xlane.xlu0 %1118 }
 0x593   :  { %v1098_v44 = vpop.xlane.xlu1 %1097  ;;  %v1090_v46 = vrot.slane %v1089_v19, 2  ;;  %v1120_v17 = vrot.slane %v1119_v53, 4 }
 0x594   :  { %v1075_v45 = vrot.slane %v1074_v9, 2  ;;  %v1099_v11 = vrot.slane %v1098_v44, 4 }
 0x595   :  { %v1121_v16 = vadd.f32 %v1120_v17, %v1119_v53  ;;  %v1091_v49 = vadd.f32 %v1090_v46, %v1089_v19 }
 0x596   :  { %v1100_v47 = vadd.f32 %v1099_v11, %v1098_v44  ;;  %v1076_v48 = vadd.f32 %v1075_v45, %v1074_v9 }
 0x597   :  { %v1122_v10 = vrot.slane %v1121_v16, 2  ;;  %v1092_v52 = vrot.slane %v1091_v49, 1 }
 0x598   :  { %v1101_v50 = vrot.slane %v1100_v47, 2  ;;  %v1077_v51 = vrot.slane %v1076_v48, 1  ;;  %v1516_v54 = vpop.eup %1515 }
 0x599   :  { %v1123_v56 = vadd.f32 %v1122_v10, %v1121_v16  ;;  %v1137_v12 = vmul.f32 %v1516_v54, %v1135_v39  ;;  %v1093_v57 = vadd.f32 %v1092_v52, %v1091_v49 }
 0x59a   :  { %v1078_v15 = vadd.f32 %v1077_v51, %v1076_v48  ;;  %v1102_v55 = vadd.f32 %v1101_v50, %v1100_v47 }
 0x59b   :  { %v1139_v60 = vsel %vm1138_vm9, %v1135_v39, %v1137_v12  ;;  %v1124_v61 = vrot.slane %v1123_v56, 1 }
 0x59c   :  { %1445 = vpush %v1078_v15  ;;  %v1103_v59 = vrot.slane %v1102_v55, 1  ;;  %v1142_v62 = vsel %vm1140_vm10, %v1141_v7, %v1139_v60 }
 0x59d   :  { %1447 = vpush %v1093_v57  ;;  %v1143_v63 = vsel %vm1069_vm8, %v1142_v62, 0.0  ;;  %v1125_v38 = vadd.f32 %v1124_v61, %v1123_v56 }
 0x59e   :  { %v1104_v20 = vadd.f32 %v1103_v59, %v1102_v55  ;;  %1144 = vadd.xlane.f32.xlu1 %v1143_v63 }
 0x5a0   :  { %1449 = vpush %v1104_v20 }
 0x5a1   :  { %1451 = vpush %v1125_v38 }
 0x5cd   :  { %s1446_s17 = spop %1445 }
 0x5ce   :  { %s1082_s0 = smul.f32 0.125, %s1446_s17  ;;  %s1448_s4 = spop %1447 }
 0x5d0   :  { %s1083_s11 = ssub.f32 0.0, %s1082_s0 }
 0x5d1   :  { %s1450_s5 = spop %1449 }
 0x5d2   :  { %s1106_s18 = sadd.f32 %s1450_s5, %s1448_s4  ;;  %s1452_s19 = spop %1451 }
 0x5d3   :  { %1162 = sst [smem:[#allocation20]] %s1083_s11 }
 0x5d4   :  { %s1127_s13 = sadd.f32 %s1452_s19, %s1106_s18 }
 0x5d5   :  { %1180 = dma.smem_to_hbm %s1607_s7, 16, %s2318_s9, [#allocation21]  }
 0x5d6   :  { %s1128_s27 = smul.f32 0.5, %s1127_s13 }
 0x5d8   :  { %s1129_s30 = smul.f32 1.25e-05, %s1128_s27 }
 0x5da   :  { %s1156_s26 = sadd.f32 %s1129_s30, %s1083_s11 }
 0x5db   :  { %1164 = sst [smem:[#allocation22]] %s1129_s30 }
 0x5dc   :  { %1188 = dma.smem_to_hbm %s1608_s28, 16, %s2319_s6, [#allocation21]  }
 0x627   :  { %v1145_v0 = vpop.xlane.xlu1 %1144 }
 0x628   :  { %v1146_v2 = vrot.slane %v1145_v0, 4 }
 0x62a   :  { %v1147_v26 = vadd.f32 %v1146_v2, %v1145_v0 }
 0x62c   :  { %v1148_v41 = vrot.slane %v1147_v26, 2 }
 0x62e   :  { %v1149_v1 = vadd.f32 %v1148_v41, %v1147_v26 }
 0x630   :  { %v1150_v23 = vrot.slane %v1149_v1, 1 }
 0x632   :  { %v1151_v3 = vadd.f32 %v1150_v23, %v1149_v1 }
 0x634   :  { %1453 = vpush %v1151_v3 }
 0x665   :  { %s1454_s15 = spop %1453 }
 0x666   :  { %s1155_s8 = smul.f32 0.125, %s1454_s15 }
 0x668   :  { %s1157_s20 = smul.f32 1e-05, %s1155_s8 }
 0x66a   :  { %s1158_s21 = sadd.f32 %s1157_s20, %s1156_s26 }
 0x66c   :  { %1160 = sst [smem:[#allocation19]] %s1158_s21 }
 0x66d   :  { %1172 = dma.smem_to_hbm %s1609_s22, 16, %s2320_s2, [#allocation12]  }
 0x66e   :  { %1597 = dma.done.wait [#allocation12], 16  }
 0x66f   :  { %1598 = vsyncadd [#allocation12], 4294967280 }
 0x670   :  { %1599 = dma.done.wait [#allocation21], 32  }
 0x671   :  { %1600 = vsyncadd [#allocation21], 4294967264 }
 0x672   :  { %1198 = sfence }
 0x673   :  { %1199 = vsyncpa [#allocation12], 1 }
 0x674   :  { %1200 = vsyncpa [#allocation21], 1 }
 0x675   :  { %1201 = vsyncpa [#allocation13], 1 }
 0x676   :  { %1202 = vsyncpa [#allocation15], 1 }
 0x677   :  { %1203 = vsyncpa [#allocation18], 1 }

</bundles_post_ra>
